<compile_context>
chip_gen: v7x
topology: tpu7x:2x2x1
jax: 0.10.0
libtpu: 0.0.40
codegen_flags: <defaults>
</compile_context>

<pallas_src>
import functools

import jax
import jax.numpy as jnp
from jax.experimental import pallas as pl
from jax.experimental.pallas import tpu as pltpu

PREC = jax.lax.Precision.HIGHEST

HID = 32       # encoder hidden width (fixed by the module: Linear(.., 32))
L1_OUT = 64    # linear1 output width (fixed: Linear(emb*2, 64))
L2_OUT = 16    # linear2 output width (fixed: Linear(64, 16))
OUT_PAD = 128  # lane-dense padded output width


def _round_up(x, m):
    return (x + m - 1) // m * m


# -----------------------------------------------------------------------------
# Kernel
# -----------------------------------------------------------------------------
def make_actor_gnn_kernel(n_rows, k1, bb, r):
    """n_rows: rows of the original state s. k1 = round_up(2*input_size, 8).
    bb: samples per grid step. r = round_up(n_rows - 1, 8) rows per sample."""
    n_neighbors = n_rows - 2
    inv_nn = 1.0 / float(n_neighbors)
    m = bb * r

    off_w23 = k1
    off_wl2 = k1 + 64
    off_wl3 = k1 + 128
    off_b = k1 + 144

    def kernel(z_ref, p_ref, out_ref):
        # Static views into the packed parameter slab (single VMEM operand).
        w1 = p_ref[0:k1, 0:64]                        # fused layer-1 weight (k1, 64)
        w23 = p_ref[off_w23:off_w23 + 64, 0:64]       # enc2 + concat + linear1, composed
        w_l2 = p_ref[off_wl2:off_wl2 + 64, 0:L2_OUT]  # (64, 16)
        w_l3 = p_ref[off_wl3:off_wl3 + L2_OUT, :]     # (16, 128), zero-padded columns
        b1 = p_ref[off_b + 0:off_b + 1, 0:64]         # [b_se1 | b_ne1]
        b_l1 = p_ref[off_b + 1:off_b + 2, 0:64]       # b_se2@w_l1a + b_ne2@w_l1b + b_l1
        b_l2 = p_ref[off_b + 2:off_b + 3, 0:L2_OUT]
        b_l3 = p_ref[off_b + 3:off_b + 4, :]          # (1, 128), zero-padded

        z = z_ref[...]                                # (bb*r, k1): r rows per sample
        # Fused layer 1 of both branches: cols 0:32 = self encoder, 32:64 = neighbor.
        h = jnp.maximum(
            jnp.dot(z, w1, preferred_element_type=jnp.float32, precision=PREC) + b1,
            0.0)                                      # (bb*r, 64)

        # Per-sample pooling (row 0 -> self, rows 1..n_neighbors -> neighbor mean),
        # done as two small matmuls against compile-time selection matrices so the
        # kernel stays purely 2-D.
        row = jax.lax.broadcasted_iota(jnp.int32, (bb, m), 0)
        col = jax.lax.broadcasted_iota(jnp.int32, (bb, m), 1)
        rel = col - row * r                           # position within each sample block
        a_self = jnp.where(rel == 0, 1.0, 0.0).astype(jnp.float32)
        a_mean = jnp.where((rel >= 1) & (rel <= n_neighbors),
                           inv_nn, 0.0).astype(jnp.float32)
        self_row = jnp.dot(a_self, h, preferred_element_type=jnp.float32,
                           precision=PREC)            # (bb, 64)
        neigh_mean = jnp.dot(a_mean, h, preferred_element_type=jnp.float32,
                             precision=PREC)          # (bb, 64)

        lane = jax.lax.broadcasted_iota(jnp.int32, (bb, 64), 1)
        g = jnp.where(lane < HID, self_row, neigh_mean)   # [h1 | mean(h2)] per sample

        # enc2(+bias) of both branches, concat, linear1 -- composed into w23/b_l1.
        x = jnp.maximum(
            jnp.dot(g, w23, preferred_element_type=jnp.float32, precision=PREC) + b_l1,
            0.0)                                      # (bb, 64)
        x = jnp.maximum(
            jnp.dot(x, w_l2, preferred_element_type=jnp.float32, precision=PREC) + b_l2,
            0.0)                                      # (bb, 16)
        out_ref[...] = jnp.dot(x, w_l3, preferred_element_type=jnp.float32,
                               precision=PREC) + b_l3  # (bb, 128), lane-dense store

    return kernel


# -----------------------------------------------------------------------------
# Host-side packing (plain JAX glue)
# -----------------------------------------------------------------------------
def pack_params(params, input_size, output_size):
    (w_se1, b_se1, w_se2, b_se2,
     w_ne1, b_ne1, w_ne2, b_ne2,
     w_l1, b_l1, w_l2, b_l2, w_l3, b_l3) = params
    d = input_size
    e = w_se2.shape[1]
    k1 = _round_up(2 * d, 8)
    assert output_size <= OUT_PAD
    dot = functools.partial(jnp.dot, precision=PREC)

    # Layer-1 block weight: rows [x1|x3] (self) and [x2_i|0] (neighbors)
    # against [[w_se1a, w_ne1], [w_se1b, 0]] -> cols 0:32 self, 32:64 neighbor.
    w_se1a, w_se1b = w_se1[:d], w_se1[d:]
    w1 = jnp.zeros((k1, 2 * HID), jnp.float32)
    w1 = w1.at[:d, :HID].set(w_se1a)
    w1 = w1.at[d:2 * d, :HID].set(w_se1b)
    w1 = w1.at[:d, HID:].set(w_ne1)
    b1 = jnp.concatenate([b_se1.reshape(1, HID), b_ne1.reshape(1, HID)], axis=-1)

    # Compose (encoder_2 ; corresponding half of linear1) -- exact (all linear).
    w_l1a, w_l1b = w_l1[:e], w_l1[e:]
    w23 = jnp.concatenate([dot(w_se2, w_l1a), dot(w_ne2, w_l1b)], axis=0)   # (64, 64)
    b_l1_eff = (dot(b_se2.reshape(1, e), w_l1a)
                + dot(b_ne2.reshape(1, e), w_l1b)
                + b_l1.reshape(1, L1_OUT))

    rows = k1 + 64 + 64 + L2_OUT + 8
    slab = jnp.zeros((rows, OUT_PAD), jnp.float32)
    slab = slab.at[0:k1, 0:64].set(w1)
    slab = slab.at[k1:k1 + 64, 0:64].set(w23)
    slab = slab.at[k1 + 64:k1 + 128, 0:L2_OUT].set(w_l2)
    slab = slab.at[k1 + 128:k1 + 128 + L2_OUT, 0:output_size].set(w_l3)
    ob = k1 + 144
    slab = slab.at[ob + 0, 0:64].set(b1[0])
    slab = slab.at[ob + 1, 0:64].set(b_l1_eff[0])
    slab = slab.at[ob + 2, 0:L2_OUT].set(b_l2.reshape(-1))
    slab = slab.at[ob + 3, 0:output_size].set(b_l3.reshape(-1))
    return slab, k1


def pack_inputs(s_batched):
    b, n, d = s_batched.shape
    k1 = _round_up(2 * d, 8)
    r = _round_up(n - 1, 8)
    z = jnp.zeros((b, r, k1), jnp.float32)
    z = z.at[:, 0, 0:d].set(s_batched[:, 0, :])          # x1 -> first half (w_se1a)
    z = z.at[:, 0, d:2 * d].set(s_batched[:, 1, :])      # x3 -> second half (w_se1b)
    z = z.at[:, 1:n - 1, 0:d].set(s_batched[:, 2:, :])   # neighbors -> first half (w_ne1)
    return z.reshape(b * r, k1), r, k1


# -----------------------------------------------------------------------------
# Forward wrappers
# -----------------------------------------------------------------------------
def actor_gnn_forward_batched(s_batched, params):
    """s_batched: (B, N, input_size) f32 -> (B, output_size) f32."""
    s_batched = jnp.asarray(s_batched, jnp.float32)
    b, n, d = s_batched.shape
    # NOTE: like the PyTorch module, N must be >= 3 (mean over s[2:] needs >=1 row).
    assert n >= 3
    out_size = params[-2].shape[1]          # w_l3: (16, output_size)
    slab, k1 = pack_params(params, d, out_size)
    z2d, r, _ = pack_inputs(s_batched)

    bb = min(_round_up(b, 8), 32)           # >=8 samples per block (dense stores)
    b_pad = _round_up(b, bb)
    if b_pad != b:
        z2d = jnp.concatenate(
            [z2d, jnp.zeros(((b_pad - b) * r, k1), jnp.float32)], axis=0)

    out = pl.pallas_call(
        make_actor_gnn_kernel(n, k1, bb, r),
        out_shape=jax.ShapeDtypeStruct((b_pad, OUT_PAD), jnp.float32),
        grid=(b_pad // bb,),
        in_specs=[
            pl.BlockSpec((bb * r, k1), lambda i: (i, 0)),   # batch block per grid step
            pl.BlockSpec(slab.shape, lambda i: (0, 0)),     # params: resident, one DMA
        ],
        out_specs=pl.BlockSpec((bb, OUT_PAD), lambda i: (i, 0)),
        compiler_params=pltpu.CompilerParams(
            dimension_semantics=("parallel",)),             # v7x: shard batch over 2 TCs
    )(z2d, slab)
    return out[:b, :out_size]


def actor_gnn_forward(s, params):
    """Single-sample forward matching the PyTorch module: (N, D) -> (output_size,)."""
    return actor_gnn_forward_batched(s[None], params)[0]


# -----------------------------------------------------------------------------
# Deterministic synthetic weights + pure-JAX reference
# -----------------------------------------------------------------------------
def init_params(key, input_size, embedding_size, output_size):
    """Weights stored transposed as (in_features, out_features); biases (1, out)."""
    def lin(k, fan_in, fan_out):
        kw, kb = jax.random.split(k)
        bound = 1.0 / jnp.sqrt(fan_in)
        w = jax.random.uniform(kw, (fan_in, fan_out), jnp.float32, -bound, bound)
        b = jax.random.uniform(kb, (1, fan_out), jnp.float32, -bound, bound)
        return w, b

    ks = jax.random.split(key, 7)
    w_se1, b_se1 = lin(ks[0], input_size * 2, HID)
    w_se2, b_se2 = lin(ks[1], HID, embedding_size)
    w_ne1, b_ne1 = lin(ks[2], input_size, HID)
    w_ne2, b_ne2 = lin(ks[3], HID, embedding_size)
    w_l1, b_l1 = lin(ks[4], embedding_size * 2, L1_OUT)
    w_l2, b_l2 = lin(ks[5], L1_OUT, L2_OUT)
    w_l3, b_l3 = lin(ks[6], L2_OUT, output_size)
    return (w_se1, b_se1, w_se2, b_se2,
            w_ne1, b_ne1, w_ne2, b_ne2,
            w_l1, b_l1, w_l2, b_l2, w_l3, b_l3)


def reference_forward(s, params):
    """Pure-JAX replica of the PyTorch forward, for correctness checks."""
    (w_se1, b_se1, w_se2, b_se2,
     w_ne1, b_ne1, w_ne2, b_ne2,
     w_l1, b_l1, w_l2, b_l2, w_l3, b_l3) = params
    dot = functools.partial(jnp.dot, precision=PREC)
    x1 = s[0:1, :]
    x3 = s[1:2, :]
    x2 = s[2:, :]
    x1 = jnp.concatenate([x1, x3], axis=-1)
    x1 = jax.nn.relu(dot(x1, w_se1) + b_se1)
    x1 = jnp.mean(dot(x1, w_se2) + b_se2, axis=0)
    x2 = jax.nn.relu(dot(x2, w_ne1) + b_ne1)
    x2 = jnp.mean(dot(x2, w_ne2) + b_ne2, axis=0)
    x = jnp.concatenate([x1, x2], axis=-1)[None, :]
    x = jax.nn.relu(dot(x, w_l1) + b_l1)
    x = jax.nn.relu(dot(x, w_l2) + b_l2)
    x = dot(x, w_l3) + b_l3
    return x[0]


if __name__ == "__main__":
    input_size = 12
    embedding_size = 32
    output_size = 4
    N = 8        # 1 self row + 1 extra self row + 6 neighbors
    B = 16       # batch of independent states processed in one pallas_call

    key = jax.random.PRNGKey(0)
    k_s, k_p = jax.random.split(key)
    s_batch = jax.random.normal(k_s, (B, N, input_size), dtype=jnp.float32)
    params = init_params(k_p, input_size, embedding_size, output_size)

    # Batched path.
    out_batch = jax.block_until_ready(actor_gnn_forward_batched(s_batch, params))
    ref_batch = jax.vmap(lambda s1: reference_forward(s1, params))(s_batch)
    assert out_batch.shape == (B, output_size)
    assert jnp.allclose(out_batch, ref_batch, atol=1e-4, rtol=1e-4), (out_batch, ref_batch)

    # Single-sample path (exact PyTorch forward signature).
    out_single = jax.block_until_ready(actor_gnn_forward(s_batch[0], params))
    assert out_single.shape == (output_size,)
    assert jnp.allclose(out_single, ref_batch[0], atol=1e-4, rtol=1e-4), (out_single,
                                                                          ref_batch[0])

    print("KERNEL_OK")
</pallas_src>

<mosaic_0001>
module attributes {stable_mosaic.version = 11 : i64} {
  func.func @kernel(%arg0: i32, %arg1: memref<128x24xf32, #tpu.memory_space<vmem>>, %arg2: memref<176x128xf32, #tpu.memory_space<vmem>>, %arg3: memref<16x128xf32, #tpu.memory_space<vmem>>) attributes {dimension_semantics = [#tpu.dimension_semantics<parallel>], iteration_bounds = array<i64: 1>, scalar_prefetch = 0 : i64, scratch_operands = 0 : i64, tpu.core_type = #tpu.core_type<tc>, window_params = [{transform_indices = @transform_0, window_bounds = array<i64: 128, 24>}, {pipeline_mode = #tpu.pipeline_mode<synchronous>, transform_indices = @transform_1, window_bounds = array<i64: 176, 128>}, {transform_indices = @transform_2, window_bounds = array<i64: 16, 128>}]} {
    %c0 = arith.constant 0 : index
    %c0_0 = arith.constant 0 : index
    %0 = vector.load %arg2[%c0, %c0_0] : memref<176x128xf32, #tpu.memory_space<vmem>>, vector<24x64xf32>
    %c24 = arith.constant 24 : index
    %c0_1 = arith.constant 0 : index
    %1 = vector.load %arg2[%c24, %c0_1] : memref<176x128xf32, #tpu.memory_space<vmem>>, vector<64x64xf32>
    %c88 = arith.constant 88 : index
    %c0_2 = arith.constant 0 : index
    %2 = vector.load %arg2[%c88, %c0_2] : memref<176x128xf32, #tpu.memory_space<vmem>>, vector<64x16xf32>
    %c152 = arith.constant 152 : index
    %c0_3 = arith.constant 0 : index
    %3 = vector.load %arg2[%c152, %c0_3] : memref<176x128xf32, #tpu.memory_space<vmem>>, vector<16x128xf32>
    %c168 = arith.constant 168 : index
    %c0_4 = arith.constant 0 : index
    %4 = vector.load %arg2[%c168, %c0_4] : memref<176x128xf32, #tpu.memory_space<vmem>>, vector<1x64xf32>
    %c169 = arith.constant 169 : index
    %c0_5 = arith.constant 0 : index
    %5 = vector.load %arg2[%c169, %c0_5] : memref<176x128xf32, #tpu.memory_space<vmem>>, vector<1x64xf32>
    %c170 = arith.constant 170 : index
    %c0_6 = arith.constant 0 : index
    %6 = vector.load %arg2[%c170, %c0_6] : memref<176x128xf32, #tpu.memory_space<vmem>>, vector<1x16xf32>
    %c171 = arith.constant 171 : index
    %c0_7 = arith.constant 0 : index
    %7 = vector.load %arg2[%c171, %c0_7] : memref<176x128xf32, #tpu.memory_space<vmem>>, vector<1x128xf32>
    %c0_8 = arith.constant 0 : index
    %c0_9 = arith.constant 0 : index
    %8 = vector.load %arg1[%c0_8, %c0_9] : memref<128x24xf32, #tpu.memory_space<vmem>>, vector<128x24xf32>
    %cst = arith.constant dense<0.000000e+00> : vector<128x64xf32>
    %9 = tpu.matmul %8, %0, %cst {dimension_numbers = #tpu.dot_dimension_numbers<[1], [0], [0], [1], [0, 0, 1, 1], [], []>, precision = #tpu.contract_precision<fp32>} : vector<128x24xf32>, vector<24x64xf32>, vector<128x64xf32> -> vector<128x64xf32>
    %10 = vector.broadcast %4 : vector<1x64xf32> to vector<128x64xf32>
    %11 = arith.addf %9, %10 : vector<128x64xf32>
    %cst_10 = arith.constant 0.000000e+00 : f32
    %12 = vector.broadcast %cst_10 : f32 to vector<128x64xf32>
    %13 = arith.maximumf %11, %12 : vector<128x64xf32>
    %14 = tpu.iota {dimensions = array<i32: 0>} : vector<16x128xi32>
    %15 = tpu.iota {dimensions = array<i32: 1>} : vector<16x128xi32>
    %c8_i32 = arith.constant 8 : i32
    %16 = vector.broadcast %c8_i32 : i32 to vector<16x128xi32>
    %17 = arith.muli %14, %16 : vector<16x128xi32>
    %18 = arith.subi %15, %17 : vector<16x128xi32>
    %c0_i32 = arith.constant 0 : i32
    %19 = vector.broadcast %c0_i32 : i32 to vector<16x128xi32>
    %20 = arith.cmpi eq, %18, %19 : vector<16x128xi32>
    %cst_11 = arith.constant 1.000000e+00 : f32
    %cst_12 = arith.constant 0.000000e+00 : f32
    %21 = vector.broadcast %cst_11 : f32 to vector<16x128xf32>
    %22 = vector.broadcast %cst_12 : f32 to vector<16x128xf32>
    %23 = arith.select %20, %21, %22 : vector<16x128xi1>, vector<16x128xf32>
    %c1_i32 = arith.constant 1 : i32
    %24 = vector.broadcast %c1_i32 : i32 to vector<16x128xi32>
    %25 = arith.cmpi sge, %18, %24 : vector<16x128xi32>
    %c6_i32 = arith.constant 6 : i32
    %26 = vector.broadcast %c6_i32 : i32 to vector<16x128xi32>
    %27 = arith.cmpi sle, %18, %26 : vector<16x128xi32>
    %28 = arith.andi %25, %27 : vector<16x128xi1>
    %cst_13 = arith.constant 0.166666672 : f32
    %cst_14 = arith.constant 0.000000e+00 : f32
    %29 = vector.broadcast %cst_13 : f32 to vector<16x128xf32>
    %30 = vector.broadcast %cst_14 : f32 to vector<16x128xf32>
    %31 = arith.select %28, %29, %30 : vector<16x128xi1>, vector<16x128xf32>
    %cst_15 = arith.constant dense<0.000000e+00> : vector<16x64xf32>
    %32 = tpu.matmul %23, %13, %cst_15 {dimension_numbers = #tpu.dot_dimension_numbers<[1], [0], [0], [1], [0, 0, 1, 1], [], []>, precision = #tpu.contract_precision<fp32>} : vector<16x128xf32>, vector<128x64xf32>, vector<16x64xf32> -> vector<16x64xf32>
    %cst_16 = arith.constant dense<0.000000e+00> : vector<16x64xf32>
    %33 = tpu.matmul %31, %13, %cst_16 {dimension_numbers = #tpu.dot_dimension_numbers<[1], [0], [0], [1], [0, 0, 1, 1], [], []>, precision = #tpu.contract_precision<fp32>} : vector<16x128xf32>, vector<128x64xf32>, vector<16x64xf32> -> vector<16x64xf32>
    %34 = tpu.iota {dimensions = array<i32: 1>} : vector<16x64xi32>
    %c32_i32 = arith.constant 32 : i32
    %35 = vector.broadcast %c32_i32 : i32 to vector<16x64xi32>
    %36 = arith.cmpi slt, %34, %35 : vector<16x64xi32>
    %37 = arith.select %36, %32, %33 : vector<16x64xi1>, vector<16x64xf32>
    %cst_17 = arith.constant dense<0.000000e+00> : vector<16x64xf32>
    %38 = tpu.matmul %37, %1, %cst_17 {dimension_numbers = #tpu.dot_dimension_numbers<[1], [0], [0], [1], [0, 0, 1, 1], [], []>, precision = #tpu.contract_precision<fp32>} : vector<16x64xf32>, vector<64x64xf32>, vector<16x64xf32> -> vector<16x64xf32>
    %39 = vector.broadcast %5 : vector<1x64xf32> to vector<16x64xf32>
    %40 = arith.addf %38, %39 : vector<16x64xf32>
    %cst_18 = arith.constant 0.000000e+00 : f32
    %41 = vector.broadcast %cst_18 : f32 to vector<16x64xf32>
    %42 = arith.maximumf %40, %41 : vector<16x64xf32>
    %cst_19 = arith.constant dense<0.000000e+00> : vector<16x16xf32>
    %43 = tpu.matmul %42, %2, %cst_19 {dimension_numbers = #tpu.dot_dimension_numbers<[1], [0], [0], [1], [0, 0, 1, 1], [], []>, precision = #tpu.contract_precision<fp32>} : vector<16x64xf32>, vector<64x16xf32>, vector<16x16xf32> -> vector<16x16xf32>
    %44 = vector.broadcast %6 : vector<1x16xf32> to vector<16x16xf32>
    %45 = arith.addf %43, %44 : vector<16x16xf32>
    %cst_20 = arith.constant 0.000000e+00 : f32
    %46 = vector.broadcast %cst_20 : f32 to vector<16x16xf32>
    %47 = arith.maximumf %45, %46 : vector<16x16xf32>
    %cst_21 = arith.constant dense<0.000000e+00> : vector<16x128xf32>
    %48 = tpu.matmul %47, %3, %cst_21 {dimension_numbers = #tpu.dot_dimension_numbers<[1], [0], [0], [1], [0, 0, 1, 1], [], []>, precision = #tpu.contract_precision<fp32>} : vector<16x16xf32>, vector<16x128xf32>, vector<16x128xf32> -> vector<16x128xf32>
    %49 = vector.broadcast %7 : vector<1x128xf32> to vector<16x128xf32>
    %50 = arith.addf %48, %49 : vector<16x128xf32>
    %c0_22 = arith.constant 0 : index
    %c0_23 = arith.constant 0 : index
    %51 = vector.load %arg3[%c0_22, %c0_23] : memref<16x128xf32, #tpu.memory_space<vmem>>, vector<16x128xf32>
    tpu.vector_store %arg3[%c0_22, %c0_23], %50 {strides = array<i32>} : memref<16x128xf32, #tpu.memory_space<vmem>>, vector<16x128xf32>,
    return
  }
  func.func @transform_0(%arg0: i32) -> (i32, i32) {
    %c0_i32 = arith.constant 0 : i32
    %c0_i32_0 = arith.constant 0 : i32
    return %arg0, %c0_i32 : i32, i32
  }
  func.func @transform_1(%arg0: i32) -> (i32, i32) {
    %c0_i32 = arith.constant 0 : i32
    %c0_i32_0 = arith.constant 0 : i32
    %c0_i32_1 = arith.constant 0 : i32
    return %c0_i32, %c0_i32_0 : i32, i32
  }
  func.func @transform_2(%arg0: i32) -> (i32, i32) {
    %c0_i32 = arith.constant 0 : i32
    %c0_i32_0 = arith.constant 0 : i32
    return %arg0, %c0_i32 : i32, i32
  }
}

</mosaic_0001>

<bundles_post_ra>
// kernel: tpu_custom_call.1
= control target key start
LH: loop header
LB: loop body
LE: loop exit
PB: predicated region body
PF: predicated region fallthrough
CT: control target
= control target key end

     0   :  { %7 = vsyncpa [#allocation3], 0  ;;  %s7460_s0 = inlined_call_operand.vmem [shape: f32[128,24], index: 0, kind: input, shape index: {}]   ;;  %s7461_s1 = inlined_call_operand.hbm [shape: f32[176,128], index: 1, kind: input, shape index: {}]   ;;  %s7462_s2 = inlined_call_operand.hbm [shape: f32[16,128], index: 2, kind: output, shape index: {}]  }
   0x1   :  { %8 = vsyncpa [#allocation4], 0  ;;  %s6534_s9 = smov [#allocation2]   ;;  %s6486_s13 = scalar_lea.hbm %s7461_s1, 2816 }
   0x2   :  { %s16_s10 = sshll.u32 %s6534_s9, 4  ;;  %p6487_p0 = scmp.ne.s32.totalorder %s7461_s1, %s6486_s13  ;;  %s17_s10 = int_to_ptr.vmem [resolvable:$true] %s16_s10 }
   0x3   :  { %p6490_p1 = scmp.lt.u32.totalorder %s6486_s13, %s7461_s1 }
   0x5   :  { %p6492_p2 = pnand %p6490_p1, %p6487_p0 }
   0x7   :  { %6495 = shalt.err (!%p6492_p2)
}
   0x8   :  { %s6496_s18 = scalar_lea.vmem %s17_s10, 2816  ;;  %p6501_p4 = scmp.lt.s32.totalorder %s17_s10, %s17_s10 }
   0x9   :  { %p6497_p3 = scmp.ne.s32.totalorder %s17_s10, %s6496_s18  ;;  %p6502_p5 = scmp.lt.s32.totalorder %s6496_s18, %s6496_s18 }
   0xb   :  { %p6503_p6 = por %p6502_p5, %p6501_p4 }
   0xd   :  { %p6504_p7 = pnand %p6503_p6, %p6497_p3 }
   0xf   :  { %6507 = shalt.err (!%p6504_p7)
}
  0x10   :  { %s6535_s19 = smov 128   ;;  %s6536_s20 = smov 8  }
  0x11   :  { %22 = dma.hbm_to_vmem [thread:$0]  %s7461_s1, 2816, %s17_s10, [#allocation3], %s6535_s19, %s6535_s19, %s6536_s20  }
  0x12   :  { %6530 = dma.done.wait [#allocation3], 2816  }
  0x13   :  { %6531 = vsyncadd [#allocation3], 4294964480  ;;  %vm71_vm0 = vcmask 195584   ;;  %v26_v0 = vld [vmem:[#allocation2] sm:$0xff]  ;;  %v27_v1 = vld [vmem:[#allocation2 + $0x8] sm:$0xff]  ;;  %vm2637_vm10 = vcmask 523264  }
  0x14   :  { %v6570_v2 = vld [vmem:[#allocation2 + $0x10] sm:$0xff]  ;;  %v121_v3 = vand.u32 4294901760, %v26_v0  ;;  %v124_v4 = vand.u32 4294901760, %v27_v1  ;;  %v51_v5 = vld [vmem:[%s7460_s0] sm:$0xff]  ;;  %v52_v6 = vld [vmem:[%s7460_s0 + $0x8] sm:$0xff]  ;;  %vm3822_vm11 = vcmask 130048  }
  0x15   :  { %v53_v7 = vld [vmem:[%s7460_s0 + $0x10] sm:$0xff]  ;;  %v6582_v8 = vand.u32 4294901760, %v6570_v2  ;;  %v73_v9 = vsel %vm71_vm0, %v51_v5, 0  ;;  %v76_v10 = vsel %vm71_vm0, %v52_v6, 0  ;;  %v54_v12 = vld [vmem:[%s7460_s0 + $0x18] sm:$0xff]  ;;  %v55_v13 = vld [vmem:[%s7460_s0 + $0x20] sm:$0xff] }
  0x16   :  { %v79_v11 = vsel %vm71_vm0, %v53_v7, 0  ;;  %v6593_v14 = vpack.c.bf16 %v124_v4, %v121_v3  ;;  %v6595_v15 = vand.u32 4294901760, %v73_v9  ;;  %v6597_v16 = vand.u32 4294901760, %v76_v10  ;;  %v56_v18 = vld [vmem:[%s7460_s0 + $0x28] sm:$0xff]  ;;  %v57_v39 = vld [vmem:[%s7460_s0 + $0x30] sm:$0xff]  ;;  %v58_v48 = vld [vmem:[%s7460_s0 + $0x38] sm:$0xff] }
  0x17   :  { %v6599_v17 = vsub.f32 %v26_v0, %v121_v3  ;;  %v6604_v19 = vsub.f32 %v27_v1, %v124_v4  ;;  %v6606_v20 = vand.u32 4294901760, %v79_v11  ;;  %v82_v21 = vsel %vm71_vm0, %v54_v12, 0  ;;  %v59_v49 = vld [vmem:[%s7460_s0 + $0x40] sm:$0xff]  ;;  %v60_v58 = vld [vmem:[%s7460_s0 + $0x48] sm:$0xff]  ;;  %v61_v59 = vld [vmem:[%s7460_s0 + $0x50] sm:$0xff] }
  0x18   :  { %v85_v22 = vsel %vm71_vm0, %v55_v13, 0  ;;  %5705 = vmatprep.subr.bf16.mxu0 %v6593_v14  ;;  %v6612_v23 = vsub.f32 %v73_v9, %v6595_v15  ;;  %v6615_v24 = vsub.f32 %v76_v10, %v6597_v16  ;;  %v6618_v26 = vand.u32 4294901760, %v82_v21  ;;  %v62_v5 = vld [vmem:[%s7460_s0 + $0x58] sm:$0xff] }
  0x19   :  { %v351_v25 = vand.u32 4294901760, %v6599_v17  ;;  %5707 = vmatpush3.bf16.msra.mxu0 %v6593_v14  ;;  %v358_v27 = vand.u32 4294901760, %v6604_v19  ;;  %v6623_v28 = vsub.f32 %v79_v11, %v6606_v20  ;;  %v6625_v29 = vand.u32 4294901760, %v85_v22 }
  0x1a   :  { %v88_v30 = vsel %vm71_vm0, %v56_v18, 0  ;;  %4838 = vmatprep.subr.mxu0 %v6582_v8  ;;  %v190_v31 = vand.u32 4294901760, %v6612_v23  ;;  %v200_v32 = vand.u32 4294901760, %v6615_v24  ;;  %v6635_v34 = vsub.f32 %v82_v21, %v6618_v26  ;;  %v63_v21 = vld [vmem:[%s7460_s0 + $0x60] sm:$0xff] }
  0x1b   :  { %v352_v33 = vsub.f32 %v6599_v17, %v351_v25  ;;  %v359_v35 = vsub.f32 %v6604_v19, %v358_v27  ;;  %v210_v36 = vand.u32 4294901760, %v6623_v28  ;;  %v6642_v37 = vsub.f32 %v85_v22, %v6625_v29 }
  0x1c   :  { %v6644_v38 = vand.u32 4294901760, %v88_v30  ;;  %v191_v40 = vsub.f32 %v6612_v23, %v190_v31  ;;  %v201_v41 = vsub.f32 %v6615_v24, %v200_v32  ;;  %v220_v43 = vand.u32 4294901760, %v6635_v34 }
  0x1d   :  { %v353_v42 = vand.u32 4294901760, %v352_v33  ;;  %4839 = vmatpush3.msra.mxu0 %v6582_v8  ;;  %v360_v44 = vand.u32 4294901760, %v359_v35  ;;  %v211_v45 = vsub.f32 %v6623_v28, %v210_v36  ;;  %v230_v46 = vand.u32 4294901760, %v6642_v37 }
  0x1e   :  { %v6662_v47 = vsub.f32 %v88_v30, %v6644_v38  ;;  %v192_v50 = vand.u32 4294901760, %v191_v40  ;;  %v202_v51 = vand.u32 4294901760, %v201_v41  ;;  %v221_v52 = vsub.f32 %v6635_v34, %v220_v43 }
  0x1f   :  { %v91_v53 = vsel %vm71_vm0, %v57_v39, 0  ;;  %v5708_v54 = vpack.c.bf16 %v360_v44, %v353_v42  ;;  %v212_v55 = vand.u32 4294901760, %v211_v45  ;;  %v231_v56 = vsub.f32 %v6642_v37, %v230_v46 }
  0x20   :  { %v240_v57 = vand.u32 4294901760, %v6662_v47  ;;  %4840 = vmatprep.mubr.f32.mxu0 %v192_v50  ;;  %v222_v60 = vand.u32 4294901760, %v221_v52  ;;  %v6684_v61 = vand.u32 4294901760, %v91_v53  ;;  %v94_v62 = vsel %vm71_vm0, %v58_v48, 0 }
  0x21   :  { %v97_v63 = vsel %vm71_vm0, %v59_v49, 0  ;;  %4841 = vmatmul.mubr.f32.vlgmr.msra.gmra.mrb[0].mxu0 %v202_v51  ;;  %5709 = vmatprep.subr.bf16.mxu0 %v5708_v54  ;;  %v232_v0 = vand.u32 4294901760, %v231_v56  ;;  %v6691_v3 = vand.u32 4294901760, %v94_v62  ;;  %v100_v7 = vsel %vm71_vm0, %v60_v58, 0 }
  0x22   :  { %v241_v1 = vsub.f32 %v6662_v47, %v240_v57  ;;  %v6693_v4 = vand.u32 4294901760, %v97_v63  ;;  %5711 = vmatpush3.bf16.msra.mxu0 %v5708_v54  ;;  %4843 = vmatprep.mubr.f32.mxu0 %v212_v55  ;;  %v6699_v6 = vsub.f32 %v91_v53, %v6684_v61  ;;  %v6704_v9 = vsub.f32 %v6570_v2, %v6582_v8  ;;  %v64_v53 = vld [vmem:[%s7460_s0 + $0x68] sm:$0xff]  ;;  %v65_v54 = vld [vmem:[%s7460_s0 + $0x70] sm:$0xff] }
  0x23   :  { %v103_v10 = vsel %vm71_vm0, %v61_v59, 0  ;;  %v6708_v12 = vsub.f32 %v94_v62, %v6691_v3  ;;  %v6713_v18 = vand.u32 4294901760, %v100_v7  ;;  %v106_v33 = vsel %vm71_vm0, %v62_v5, 0 }
  0x24   :  { %v242_v11 = vand.u32 4294901760, %v241_v1  ;;  %v6711_v13 = vsub.f32 %v97_v63, %v6693_v4  ;;  %v250_v22 = vand.u32 4294901760, %v6699_v6  ;;  %v6720_v2 = vand.u32 4294901760, %v6704_v9  ;;  %v66_v1 = vld [vmem:[%s7460_s0 + $0x78] sm:$0xff]  ;;  %s6539_s0 = smov [#allocation5]  }
  0x25   :  { %v6722_v30 = vand.u32 4294901760, %v103_v10  ;;  %4844 = vmatmul.mubr.f32.gmra.mrb[2].mxu0 %v222_v60  ;;  %v260_v35 = vand.u32 4294901760, %v6708_v12  ;;  %v6728_v40 = vsub.f32 %v100_v7, %v6713_v18  ;;  %v6730_v41 = vand.u32 4294901760, %v106_v33  ;;  %s4338_s28 = sshll.u32 %s6539_s0, 4  ;;  %s4339_s28 = int_to_ptr.vmem [resolvable:$true] %s4338_s28 }
  0x26   :  { %v270_v39 = vand.u32 4294901760, %v6711_v13  ;;  %4846 = vmatprep.mubr.f32.mxu0 %v232_v0  ;;  %v251_v42 = vsub.f32 %v6699_v6, %v250_v22  ;;  %v366_v44 = vsub.f32 %v6704_v9, %v6720_v2  ;;  %v109_v48 = vsel %vm71_vm0, %v63_v21, 0  ;;  %s6508_s1 = scalar_lea.vmem %s4339_s28, 256  ;;  %p6513_p9 = scmp.lt.s32.totalorder %s4339_s28, %s4339_s28 }
  0x27   :  { %v6738_v45 = vsub.f32 %v103_v10, %v6722_v30  ;;  %v261_v49 = vsub.f32 %v6708_v12, %v260_v35  ;;  %v280_v51 = vand.u32 4294901760, %v6728_v40  ;;  %v6749_v52 = vsub.f32 %v106_v33, %v6730_v41  ;;  %p6509_p8 = scmp.ne.s32.totalorder %s4339_s28, %s6508_s1  ;;  %p6514_p10 = scmp.lt.s32.totalorder %s6508_s1, %s6508_s1 }
  0x28   :  { %v271_v50 = vsub.f32 %v6711_v13, %v270_v39  ;;  %v252_v55 = vand.u32 4294901760, %v251_v42  ;;  %v367_v56 = vand.u32 4294901760, %v366_v44  ;;  %v6758_v59 = vand.u32 4294901760, %v109_v48 }
  0x29   :  { %v290_v58 = vand.u32 4294901760, %v6738_v45  ;;  %4847 = vmatmul.mubr.f32.gmra.mrb[4].mxu0 %v242_v11  ;;  %v262_v60 = vand.u32 4294901760, %v261_v49  ;;  %v281_v63 = vsub.f32 %v6728_v40, %v280_v51  ;;  %v300_v0 = vand.u32 4294901760, %v6749_v52  ;;  %p6515_p11 = por %p6514_p10, %p6513_p9 }
  0x2a   :  { %v272_v62 = vand.u32 4294901760, %v271_v50  ;;  %4849 = vmatprep.mubr.f32.mxu0 %v252_v55  ;;  %4868 = vmatprep.subr.mxu0 %v367_v56  ;;  %v6771_v7 = vsub.f32 %v109_v48, %v6758_v59  ;;  %v112_v10 = vsel %vm71_vm0, %v64_v53, 0  ;;  %v115_v11 = vsel %vm71_vm0, %v65_v54, 0 }
  0x2b   :  { %v291_v5 = vsub.f32 %v6738_v45, %v290_v58  ;;  %4869 = vmatpush3.msra.mxu0 %v367_v56  ;;  %v6775_v21 = vand.u32 4294901760, %v112_v10  ;;  %v6777_v33 = vand.u32 4294901760, %v115_v11  ;;  %v282_v42 = vand.u32 4294901760, %v281_v63  ;;  %p6516_p12 = pnand %p6515_p11, %p6509_p8 }
  0x2c   :  { %v7463_v44 = vand.u32 4294901760, %v6771_v7  ;;  %v118_v49 = vsel %vm71_vm0, %v66_v1, 0  ;;  %v5712_v50 = vpack.c.bf16 %v6604_v19, %v6599_v17  ;;  %v301_v48 = vsub.f32 %v6749_v52, %v300_v0 }
  0x2d   :  { %4850 = vmatmul.mubr.f32.gmra.mrb[6].mxu0 %v262_v60  ;;  %v6787_v53 = vsub.f32 %v112_v10, %v6775_v21  ;;  %v6790_v54 = vsub.f32 %v115_v11, %v6777_v33  ;;  %v6792_v55 = vand.u32 4294901760, %v118_v49  ;;  %v292_v56 = vand.u32 4294901760, %v291_v5 }
  0x2e   :  { %4852 = vmatprep.mubr.f32.mxu0 %v272_v62  ;;  %v311_v63 = vsub.f32 %v6771_v7, %v7463_v44  ;;  %5713 = vmatprep.subr.bf16.mxu0 %v5712_v50  ;;  %v5720_v60 = vpack.c.bf16 %v358_v27, %v351_v25  ;;  %v302_v62 = vand.u32 4294901760, %v301_v48 }
  0x2f   :  { %v320_v1 = vand.u32 4294901760, %v6787_v53  ;;  %v330_v10 = vand.u32 4294901760, %v6790_v54  ;;  %v6804_v11 = vsub.f32 %v118_v49, %v6792_v55 }
  0x30   :  { %v312_v17 = vand.u32 4294901760, %v311_v63 }
  0x31   :  { %4853 = vmatmul.mubr.f32.gmra.mrb[8].mxu0 %v282_v42  ;;  %v321_v5 = vsub.f32 %v6787_v53, %v320_v1  ;;  %v340_v44 = vand.u32 4294901760, %v6804_v11  ;;  %v331_v19 = vsub.f32 %v6790_v54, %v330_v10 }
  0x32   :  { %4855 = vmatprep.mubr.f32.mxu0 %v292_v56 }
  0x33   :  { %v322_v25 = vand.u32 4294901760, %v321_v5  ;;  %v341_v27 = vsub.f32 %v6804_v11, %v340_v44  ;;  %v332_v42 = vand.u32 4294901760, %v331_v19 }
  0x35   :  { %4856 = vmatmul.mubr.f32.gmra.mrb[10].mxu0 %v302_v62  ;;  %v342_v49 = vand.u32 4294901760, %v341_v27 }
  0x36   :  { %4858 = vmatprep.mubr.f32.mxu0 %v312_v17 }
  0x39   :  { %4859 = vmatmul.mubr.f32.gmra.mrb[12].mxu0 %v322_v25 }
  0x3a   :  { %4861 = vmatprep.mubr.f32.mxu0 %v332_v42 }
  0x3d   :  { %4862 = vmatmul.mubr.f32.gmra.mrb[14].mxu0 %v342_v49 }
  0x3e   :  { %4870 = vmatprep.mubr.f32.mxu0 %v6595_v15 }
  0x41   :  { %4871 = vmatmul.mubr.f32.vlgmr.msra.gmra.mrb[0].mxu0 %v6597_v16 }
  0x42   :  { %5715 = vmatpush3.bf16.msra.mxu0 %v5712_v50  ;;  %4873 = vmatprep.mubr.f32.mxu0 %v6606_v20 }
  0x43   :  { %4898 = vmatprep.subr.mxu0 %v6704_v9 }
  0x45   :  { %4874 = vmatmul.mubr.f32.gmra.mrb[2].mxu0 %v6618_v26 }
  0x46   :  { %4876 = vmatprep.mubr.f32.mxu0 %v6625_v29  ;;  %4899 = vmatpush3.msra.mxu0 %v6704_v9  ;;  %v6959_v9 = vld [vmem:[#allocation2 + $0xa8] ss:$0 sm:$0xff] }
  0x47   :  { %5717 = vmatprep.subr.bf16.mxu0 %v6593_v14 }
  0x49   :  { %4877 = vmatmul.mubr.f32.gmra.mrb[4].mxu0 %v6644_v38 }
  0x4a   :  { %4879 = vmatprep.mubr.f32.mxu0 %v6684_v61 }
  0x4d   :  { %4880 = vmatmul.mubr.f32.gmra.mrb[6].mxu0 %v6691_v3 }
  0x4e   :  { %4882 = vmatprep.mubr.f32.mxu0 %v6693_v4 }
  0x51   :  { %4883 = vmatmul.mubr.f32.gmra.mrb[8].mxu0 %v6713_v18 }
  0x52   :  { %4885 = vmatprep.mubr.f32.mxu0 %v6722_v30 }
  0x55   :  { %4886 = vmatmul.mubr.f32.gmra.mrb[10].mxu0 %v6730_v41 }
  0x56   :  { %4888 = vmatprep.mubr.f32.mxu0 %v6758_v59 }
  0x59   :  { %4889 = vmatmul.mubr.f32.gmra.mrb[12].mxu0 %v6775_v21 }
  0x5a   :  { %4891 = vmatprep.mubr.f32.mxu0 %v6777_v33 }
  0x5d   :  { %4892 = vmatmul.mubr.f32.gmra.mrb[14].mxu0 %v6792_v55 }
  0x5e   :  { %4900 = vmatprep.mubr.f32.mxu0 %v6612_v23  ;;  %v7476_v23 = vand.u32 4294901760, %v6771_v7 }
  0x61   :  { %4901 = vmatmul.mubr.f32.vlgmr.msra.gmra.mrb[0].mxu0 %v6615_v24 }
  0x62   :  { %5719 = vmatpush3.bf16.msra.mxu0 %v6593_v14  ;;  %4903 = vmatprep.mubr.f32.mxu0 %v6623_v28 }
  0x63   :  { %4928 = vmatprep.subr.mxu0 %v6582_v8 }
  0x65   :  { %4904 = vmatmul.mubr.f32.gmra.mrb[2].mxu0 %v6635_v34 }
  0x66   :  { %4906 = vmatprep.mubr.f32.mxu0 %v6642_v37  ;;  %4929 = vmatpush3.msra.mxu0 %v6582_v8 }
  0x67   :  { %5721 = vmatprep.subr.bf16.mxu0 %v5720_v60 }
  0x69   :  { %4907 = vmatmul.mubr.f32.gmra.mrb[4].mxu0 %v6662_v47 }
  0x6a   :  { %4909 = vmatprep.mubr.f32.mxu0 %v6699_v6 }
  0x6d   :  { %4910 = vmatmul.mubr.f32.gmra.mrb[6].mxu0 %v6708_v12 }
  0x6e   :  { %4912 = vmatprep.mubr.f32.mxu0 %v6711_v13 }
  0x71   :  { %4913 = vmatmul.mubr.f32.gmra.mrb[8].mxu0 %v6728_v40 }
  0x72   :  { %4915 = vmatprep.mubr.f32.mxu0 %v6738_v45 }
  0x75   :  { %4916 = vmatmul.mubr.f32.gmra.mrb[10].mxu0 %v6749_v52 }
  0x76   :  { %4918 = vmatprep.mubr.f32.mxu0 %v6771_v7 }
  0x79   :  { %4919 = vmatmul.mubr.f32.gmra.mrb[12].mxu0 %v6787_v53 }
  0x7a   :  { %4921 = vmatprep.mubr.f32.mxu0 %v6790_v54 }
  0x7d   :  { %4922 = vmatmul.mubr.f32.gmra.mrb[14].mxu0 %v6804_v11 }
  0x7e   :  { %4930 = vmatprep.mubr.f32.mxu0 %v190_v31 }
  0x81   :  { %4931 = vmatmul.mubr.f32.vlgmr.msra.gmra.mrb[0].mxu0 %v200_v32 }
  0x82   :  { %5723 = vmatpush3.bf16.msra.mxu0 %v5720_v60  ;;  %4933 = vmatprep.mubr.f32.mxu0 %v210_v36 }
  0x83   :  { %4958 = vmatprep.subr.mxu0 %v6720_v2 }
  0x85   :  { %4934 = vmatmul.mubr.f32.gmra.mrb[2].mxu0 %v220_v43 }
  0x86   :  { %4936 = vmatprep.mubr.f32.mxu0 %v230_v46  ;;  %4959 = vmatpush3.msra.mxu0 %v6720_v2 }
  0x87   :  { %5725 = vmatprep.subr.bf16.mxu0 %v6593_v14 }
  0x89   :  { %4937 = vmatmul.mubr.f32.gmra.mrb[4].mxu0 %v240_v57 }
  0x8a   :  { %4939 = vmatprep.mubr.f32.mxu0 %v250_v22 }
  0x8d   :  { %4940 = vmatmul.mubr.f32.gmra.mrb[6].mxu0 %v260_v35 }
  0x8e   :  { %4942 = vmatprep.mubr.f32.mxu0 %v270_v39 }
  0x91   :  { %4943 = vmatmul.mubr.f32.gmra.mrb[8].mxu0 %v280_v51 }
  0x92   :  { %4945 = vmatprep.mubr.f32.mxu0 %v290_v58 }
  0x95   :  { %4946 = vmatmul.mubr.f32.gmra.mrb[10].mxu0 %v300_v0 }
  0x96   :  { %4948 = vmatprep.mubr.f32.mxu0 %v7476_v23 }
  0x99   :  { %4949 = vmatmul.mubr.f32.gmra.mrb[12].mxu0 %v320_v1 }
  0x9a   :  { %4951 = vmatprep.mubr.f32.mxu0 %v330_v10 }
  0x9d   :  { %4952 = vmatmul.mubr.f32.gmra.mrb[14].mxu0 %v340_v44 }
  0x9e   :  { %4960 = vmatprep.mubr.f32.mxu0 %v6595_v15 }
  0xa1   :  { %4961 = vmatmul.mubr.f32.vlgmr.msra.gmra.mrb[0].mxu0 %v6597_v16 }
  0xa2   :  { %5727 = vmatpush3.bf16.msra.mxu0 %v6593_v14  ;;  %4963 = vmatprep.mubr.f32.mxu0 %v6606_v20 }
  0xa3   :  { %4988 = vmatprep.subr.mxu0 %v6582_v8 }
  0xa5   :  { %4964 = vmatmul.mubr.f32.gmra.mrb[2].mxu0 %v6618_v26 }
  0xa6   :  { %4966 = vmatprep.mubr.f32.mxu0 %v6625_v29  ;;  %4989 = vmatpush3.msra.mxu0 %v6582_v8  ;;  %v1253_v8 = vlaneseq }
  0xa8   :  { %v1254_v14 = vshrl.u32 %v1253_v8, 7 }
  0xa9   :  { %4967 = vmatmul.mubr.f32.gmra.mrb[4].mxu0 %v6644_v38 }
  0xaa   :  { %4969 = vmatprep.mubr.f32.mxu0 %v6684_v61 }
  0xad   :  { %4970 = vmatmul.mubr.f32.gmra.mrb[6].mxu0 %v6691_v3 }
  0xae   :  { %4972 = vmatprep.mubr.f32.mxu0 %v6693_v4 }
  0xb1   :  { %4973 = vmatmul.mubr.f32.gmra.mrb[8].mxu0 %v6713_v18 }
  0xb2   :  { %4975 = vmatprep.mubr.f32.mxu0 %v6722_v30 }
  0xb5   :  { %4976 = vmatmul.mubr.f32.gmra.mrb[10].mxu0 %v6730_v41 }
  0xb6   :  { %4978 = vmatprep.mubr.f32.mxu0 %v6758_v59 }
  0xb9   :  { %4979 = vmatmul.mubr.f32.gmra.mrb[12].mxu0 %v6775_v21 }
  0xba   :  { %4981 = vmatprep.mubr.f32.mxu0 %v6777_v33 }
  0xbd   :  { %4982 = vmatmul.mubr.f32.gmra.mrb[14].mxu0 %v6792_v55 }
  0xbe   :  { %4990 = vmatprep.mubr.f32.mxu0 %v6595_v15  ;;  %v1255_v15 = vadd.s32 8, %v1254_v14 }
  0xc0   :  { %v1259_v24 = vmul.u32 8, %v1255_v15 }
  0xc1   :  { %4991 = vmatmul.mubr.f32.vlgmr.msra.gmra.mrb[0].mxu0 %v6597_v16  ;;  %v6924_v16 = vand.u32 127, %v1253_v8 }
  0xc2   :  { %4993 = vmatprep.mubr.f32.mxu0 %v6606_v20  ;;  %v1258_v20 = vmul.u32 8, %v1254_v14 }
  0xc3   :  { %v6930_v28 = vsub.s32 %v6924_v16, %v1259_v24  ;;  %vm2630_vm9 = vcmp.lt.s32.totalorder %v6924_v16, 32 }
  0xc5   :  { %4994 = vmatmul.mubr.f32.gmra.mrb[2].mxu0 %v6618_v26  ;;  %v6927_v26 = vsub.s32 %v6924_v16, %v1258_v20  ;;  %vm1267_vm3 = vcmp.ge.s32.totalorder %v6930_v28, 1  ;;  %vm1269_vm4 = vcmp.le.s32.totalorder %v6930_v28, 6  ;;  %vm1263_vm8 = vcmp.eq.s32.totalorder %v6930_v28, 0 }
  0xc6   :  { %4996 = vmatprep.mubr.f32.mxu0 %v6625_v29  ;;  %vm1271_vm6 = vmand %vm1267_vm3, %vm1269_vm4  ;;  %v6537_v29 = vmov 0.0  }
  0xc7   :  { %vm1266_vm1 = vcmp.ge.s32.totalorder %v6927_v26, 1  ;;  %vm1268_vm2 = vcmp.le.s32.totalorder %v6927_v26, 6  ;;  %vm1262_vm7 = vcmp.eq.s32.totalorder %v6927_v26, 0  ;;  %v1273_v32 = vsel %vm1271_vm6, 0.16666667, %v6537_v29  ;;  %v29_v26 = vld [vmem:[#allocation2 + $0x18] sm:$0xff] }
  0xc8   :  { %vm1270_vm5 = vmand %vm1266_vm1, %vm1268_vm2  ;;  %v1264_v36 = vsel %vm1262_vm7, 1.0, %v6537_v29  ;;  %v6957_v6 = vand.u32 4294901760, %v1273_v32 }
  0xc9   :  { %4997 = vmatmul.mubr.f32.gmra.mrb[4].mxu0 %v6644_v38  ;;  %v1272_v31 = vsel %vm1270_vm5, 0.16666667, %v6537_v29  ;;  %v6941_v37 = vsub.f32 %v1264_v36, %v1264_v36 }
  0xca   :  { %4999 = vmatprep.mubr.f32.mxu0 %v6684_v61  ;;  %v6937_v34 = vand.u32 4294901760, %v1272_v31  ;;  %v6965_v2 = vsub.f32 %v1273_v32, %v6957_v6 }
  0xcb   :  { %v7467_v43 = vand.u32 4294901760, %v6941_v37 }
  0xcc   :  { %v6944_v38 = vsub.f32 %v1272_v31, %v6937_v34  ;;  %v7464_v58 = vand.u32 4294901760, %v6965_v2 }
  0xcd   :  { %5000 = vmatmul.mubr.f32.gmra.mrb[6].mxu0 %v6691_v3  ;;  %v1357_v47 = vsub.f32 %v6941_v37, %v7467_v43 }
  0xce   :  { %5002 = vmatprep.mubr.f32.mxu0 %v6693_v4  ;;  %v7466_v46 = vand.u32 4294901760, %v6944_v38  ;;  %v1265_v4 = vsel %vm1263_vm8, 1.0, %v6537_v29  ;;  %v6988_v60 = vsub.f32 %v6965_v2, %v7464_v58 }
  0xcf   :  { %v1358_v61 = vand.u32 4294901760, %v1357_v47  ;;  %v6961_v12 = vsub.f32 %v1265_v4, %v1265_v4 }
  0xd0   :  { %v2030_v57 = vsub.f32 %v6944_v38, %v7466_v46 }
  0xd1   :  { %5003 = vmatmul.mubr.f32.gmra.mrb[8].mxu0 %v6713_v18  ;;  %5046 = vmatprep.mubr.f32.mxu1 %v1358_v61  ;;  %v7465_v39 = vand.u32 4294901760, %v6961_v12 }
  0xd2   :  { %5005 = vmatprep.mubr.f32.mxu0 %v6722_v30  ;;  %v2031_v3 = vand.u32 4294901760, %v2030_v57 }
  0xd5   :  { %5006 = vmatmul.mubr.f32.gmra.mrb[10].mxu0 %v6730_v41 }
  0xd6   :  { %5008 = vmatprep.mubr.f32.mxu0 %v6758_v59 }
  0xd9   :  { %5009 = vmatmul.mubr.f32.gmra.mrb[12].mxu0 %v6775_v21 }
  0xda   :  { %5011 = vmatprep.mubr.f32.mxu0 %v6777_v33  ;;  %v6977_v33 = vsub.f32 %v6961_v12, %v7465_v39 }
  0xdd   :  { %5012 = vmatmul.mubr.f32.gmra.mrb[14].mxu0 %v6792_v55 }
  0xde   :  { %5256 = vmatprep.mubr.f32.mxu0 %v2031_v3 }
 0x194   :  { %v4992_v13 = vpop.f32.mrb[0].mxu0 }
 0x195   :  { %v6328_v18 = vadd.f32 %v4992_v13, %v6959_v9  ;;  %v1143_v22 = vpop.f32.mrb[1].mxu0 }
 0x196   :  { %v6329_v30 = vadd.f32 %v6959_v9, %v1143_v22 }
 0x197   :  { %v1238_v35 = vmax.f32 %v6328_v18, 0.0 }
 0x198   :  { %v1237_v40 = vmax.f32 %v6329_v30, 0.0  ;;  %v4995_v41 = vpop.f32.mrb[2].mxu0 }
 0x199   :  { %v1278_v45 = vand.u32 4294901760, %v1238_v35  ;;  %v6330_v51 = vadd.f32 %v4995_v41, %v6959_v9  ;;  %v1155_v52 = vpop.f32.mrb[3].mxu0 }
 0x19a   :  { %v1275_v59 = vand.u32 4294901760, %v1237_v40  ;;  %v6331_v0 = vadd.f32 %v6959_v9, %v1155_v52 }
 0x19b   :  { %v6972_v7 = vsub.f32 %v1238_v35, %v1278_v45  ;;  %v1240_v21 = vmax.f32 %v6330_v51, 0.0 }
 0x19c   :  { %v6979_v44 = vpack.c.bf16 %v1278_v45, %v1275_v59  ;;  %v6981_v50 = vsub.f32 %v1237_v40, %v1275_v59  ;;  %v1239_v48 = vmax.f32 %v6331_v0, 0.0  ;;  %v4998_v53 = vpop.f32.mrb[4].mxu0 }
 0x19d   :  { %v1383_v54 = vand.u32 4294901760, %v6972_v7  ;;  %v1284_v55 = vand.u32 4294901760, %v1240_v21  ;;  %v6332_v56 = vadd.f32 %v4998_v53, %v6959_v9  ;;  %v1167_v63 = vpop.f32.mrb[5].mxu0 }
 0x19e   :  { %v1376_v1 = vand.u32 4294901760, %v6981_v50  ;;  %v1281_v10 = vand.u32 4294901760, %v1239_v48  ;;  %v6333_v11 = vadd.f32 %v6959_v9, %v1167_v63  ;;  %5729 = vmatprep.subr.bf16.mxu1 %v6979_v44  ;;  %5921 = vmatprep.subr.bf16.mxu0 %v6979_v44  ;;  %v6996_v62 = vpack.c.bf16 %v6972_v7, %v6981_v50 }
 0x19f   :  { %v1384_v5 = vsub.f32 %v6972_v7, %v1383_v54  ;;  %v7001_v17 = vsub.f32 %v1240_v21, %v1284_v55  ;;  %v1242_v19 = vmax.f32 %v6332_v56, 0.0  ;;  %5731 = vmatpush3.bf16.msra.mxu1 %v6979_v44  ;;  %5923 = vmatpush3.bf16.msra.mxu0 %v6979_v44 }
 0x1a0   :  { %v1377_v27 = vsub.f32 %v6981_v50, %v1376_v1  ;;  %v7009_v42 = vpack.c.bf16 %v1284_v55, %v1281_v10  ;;  %v7011_v49 = vsub.f32 %v1239_v48, %v1281_v10  ;;  %v1241_v23 = vmax.f32 %v6333_v11, 0.0  ;;  %v5001_v8 = vpop.f32.mrb[6].mxu0 }
 0x1a1   :  { %v1385_v14 = vand.u32 4294901760, %v1384_v5  ;;  %v7475_v15 = vand.u32 4294901760, %v7001_v17  ;;  %v1290_v20 = vand.u32 4294901760, %v1242_v19  ;;  %v6334_v24 = vadd.f32 %v5001_v8, %v6959_v9  ;;  %v1179_v29 = vpop.f32.mrb[7].mxu0 }
 0x1a2   :  { %v1378_v31 = vand.u32 4294901760, %v1377_v27  ;;  %v1390_v32 = vand.u32 4294901760, %v7011_v49  ;;  %v1287_v36 = vand.u32 4294901760, %v1241_v23  ;;  %v6335_v47 = vadd.f32 %v6959_v9, %v1179_v29  ;;  %5733 = vmatprep.subr.bf16.mxu1 %v7009_v42  ;;  %5925 = vmatprep.subr.bf16.mxu0 %v7009_v42 }
 0x1a3   :  { %v1398_v57 = vsub.f32 %v7001_v17, %v7475_v15  ;;  %v7022_v61 = vsub.f32 %v1242_v19, %v1290_v20  ;;  %v1244_v3 = vmax.f32 %v6334_v24, 0.0  ;;  %5735 = vmatpush3.bf16.msra.mxu1 %v7009_v42  ;;  %5927 = vmatpush3.bf16.msra.mxu0 %v7009_v42  ;;  %v7028_v4 = vpack.c.bf16 %v7001_v17, %v7011_v49 }
 0x1a4   :  { %v1391_v13 = vsub.f32 %v7011_v49, %v1390_v32  ;;  %v7033_v18 = vpack.c.bf16 %v1290_v20, %v1287_v36  ;;  %v7035_v22 = vsub.f32 %v1241_v23, %v1287_v36  ;;  %v1243_v30 = vmax.f32 %v6335_v47, 0.0  ;;  %v5004_v35 = vpop.f32.mrb[8].mxu0 }
 0x1a5   :  { %v1399_v40 = vand.u32 4294901760, %v1398_v57  ;;  %v7473_v41 = vand.u32 4294901760, %v7022_v61  ;;  %v1296_v45 = vand.u32 4294901760, %v1244_v3  ;;  %v6336_v51 = vadd.f32 %v5004_v35, %v6959_v9  ;;  %v1191_v52 = vpop.f32.mrb[9].mxu0 }
 0x1a6   :  { %v1392_v59 = vand.u32 4294901760, %v1391_v13  ;;  %v7474_v0 = vand.u32 4294901760, %v7035_v22  ;;  %v1293_v21 = vand.u32 4294901760, %v1243_v30  ;;  %v6337_v48 = vadd.f32 %v6959_v9, %v1191_v52  ;;  %5737 = vmatprep.subr.bf16.mxu1 %v7033_v18  ;;  %5929 = vmatprep.subr.bf16.mxu0 %v7033_v18 }
 0x1a7   :  { %v1412_v53 = vsub.f32 %v7022_v61, %v7473_v41  ;;  %v7046_v55 = vsub.f32 %v1244_v3, %v1296_v45  ;;  %v1246_v56 = vmax.f32 %v6336_v51, 0.0  ;;  %5739 = vmatpush3.bf16.msra.mxu1 %v7033_v18  ;;  %5931 = vmatpush3.bf16.msra.mxu0 %v7033_v18  ;;  %v7050_v63 = vpack.c.bf16 %v1385_v14, %v1378_v31 }
 0x1a8   :  { %v1405_v10 = vsub.f32 %v7035_v22, %v7474_v0  ;;  %v7055_v11 = vpack.c.bf16 %v1296_v45, %v1293_v21  ;;  %v7057_v5 = vsub.f32 %v1243_v30, %v1293_v21  ;;  %v1245_v19 = vmax.f32 %v6337_v48, 0.0  ;;  %v5007_v27 = vpop.f32.mrb[10].mxu0 }
 0x1a9   :  { %v1413_v23 = vand.u32 4294901760, %v1412_v53  ;;  %v7470_v8 = vand.u32 4294901760, %v7046_v55  ;;  %v1302_v20 = vand.u32 4294901760, %v1246_v56  ;;  %v6338_v24 = vadd.f32 %v5007_v27, %v6959_v9  ;;  %v1203_v29 = vpop.f32.mrb[11].mxu0 }
 0x1aa   :  { %v1406_v36 = vand.u32 4294901760, %v1405_v10  ;;  %v7471_v14 = vand.u32 4294901760, %v7057_v5  ;;  %v1299_v31 = vand.u32 4294901760, %v1245_v19  ;;  %v6339_v47 = vadd.f32 %v6959_v9, %v1203_v29  ;;  %5741 = vmatprep.subr.bf16.mxu1 %v7055_v11  ;;  %5933 = vmatprep.subr.bf16.mxu0 %v7055_v11 }
 0x1ab   :  { %v1426_v57 = vsub.f32 %v7046_v55, %v7470_v8  ;;  %v7068_v3 = vsub.f32 %v1246_v56, %v1302_v20  ;;  %v1248_v13 = vmax.f32 %v6338_v24, 0.0  ;;  %5743 = vmatpush3.bf16.msra.mxu1 %v7055_v11  ;;  %5935 = vmatpush3.bf16.msra.mxu0 %v7055_v11  ;;  %v7072_v30 = vpack.c.bf16 %v1399_v40, %v1392_v59 }
 0x1ac   :  { %v1419_v35 = vsub.f32 %v7057_v5, %v7471_v14  ;;  %v7077_v45 = vpack.c.bf16 %v1302_v20, %v1299_v31  ;;  %v7079_v51 = vsub.f32 %v1245_v19, %v1299_v31  ;;  %v1247_v52 = vmax.f32 %v6339_v47, 0.0  ;;  %v5010_v21 = vpop.f32.mrb[12].mxu0 }
 0x1ad   :  { %v1427_v48 = vand.u32 4294901760, %v1426_v57  ;;  %v7468_v53 = vand.u32 4294901760, %v7068_v3  ;;  %v1308_v56 = vand.u32 4294901760, %v1248_v13  ;;  %v6340_v10 = vadd.f32 %v5010_v21, %v6959_v9  ;;  %v1215_v27 = vpop.f32.mrb[13].mxu0 }
 0x1ae   :  { %v1420_v24 = vand.u32 4294901760, %v1419_v35  ;;  %v7469_v40 = vand.u32 4294901760, %v7079_v51  ;;  %v1305_v59 = vand.u32 4294901760, %v1247_v52  ;;  %v6341_v29 = vadd.f32 %v6959_v9, %v1215_v27  ;;  %5745 = vmatprep.subr.bf16.mxu1 %v7077_v45  ;;  %5937 = vmatprep.subr.bf16.mxu0 %v7077_v45 }
 0x1af   :  { %v1440_v19 = vsub.f32 %v7068_v3, %v7468_v53  ;;  %v7090_v20 = vsub.f32 %v1248_v13, %v1308_v56  ;;  %v1250_v31 = vmax.f32 %v6340_v10, 0.0  ;;  %5747 = vmatpush3.bf16.msra.mxu1 %v7077_v45  ;;  %5939 = vmatpush3.bf16.msra.mxu0 %v7077_v45  ;;  %v7094_v47 = vpack.c.bf16 %v1413_v23, %v1406_v36 }
 0x1b0   :  { %v1433_v57 = vsub.f32 %v7079_v51, %v7469_v40  ;;  %v7099_v35 = vpack.c.bf16 %v1308_v56, %v1305_v59  ;;  %v7101_v21 = vsub.f32 %v1247_v52, %v1305_v59  ;;  %v1249_v27 = vmax.f32 %v6341_v29, 0.0  ;;  %v5013_v58 = vpop.f32.mrb[14].mxu0 }
 0x1b1   :  { %v1441_v39 = vand.u32 4294901760, %v1440_v19  ;;  %v7472_v13 = vand.u32 4294901760, %v7090_v20  ;;  %v1314_v10 = vand.u32 4294901760, %v1250_v31  ;;  %v6342_v46 = vadd.f32 %v5013_v58, %v6959_v9  ;;  %v1227_v43 = vpop.f32.mrb[15].mxu0 }
 0x1b2   :  { %v1434_v25 = vand.u32 4294901760, %v1433_v57  ;;  %v1446_v23 = vand.u32 4294901760, %v7101_v21  ;;  %v1311_v36 = vand.u32 4294901760, %v1249_v27  ;;  %v6343_v53 = vadd.f32 %v6959_v9, %v1227_v43  ;;  %5749 = vmatprep.subr.bf16.mxu1 %v7099_v35  ;;  %5941 = vmatprep.subr.bf16.mxu0 %v7099_v35 }
 0x1b3   :  { %v1454_v52 = vsub.f32 %v7090_v20, %v7472_v13  ;;  %v1466_v56 = vsub.f32 %v1250_v31, %v1314_v10  ;;  %v1252_v59 = vmax.f32 %v6342_v46, 0.0  ;;  %5751 = vmatpush3.bf16.msra.mxu1 %v7099_v35  ;;  %5943 = vmatpush3.bf16.msra.mxu0 %v7099_v35  ;;  %v7114_v58 = vpack.c.bf16 %v1427_v48, %v1420_v24 }
 0x1b4   :  { %v1447_v29 = vsub.f32 %v7101_v21, %v1446_v23  ;;  %v7117_v19 = vpack.c.bf16 %v1314_v10, %v1311_v36  ;;  %v1459_v43 = vsub.f32 %v1249_v27, %v1311_v36  ;;  %v1251_v9 = vmax.f32 %v6343_v53, 0.0 }
 0x1b5   :  { %v1455_v57 = vand.u32 4294901760, %v1454_v52  ;;  %v1467_v40 = vand.u32 4294901760, %v1466_v56  ;;  %v1320_v8 = vand.u32 4294901760, %v1252_v59  ;;  %v7119_v14 = vpack.c.bf16 %v1441_v39, %v1434_v25 }
 0x1b6   :  { %v1448_v13 = vand.u32 4294901760, %v1447_v29  ;;  %v1460_v31 = vand.u32 4294901760, %v1459_v43  ;;  %v1317_v46 = vand.u32 4294901760, %v1251_v9  ;;  %5753 = vmatprep.subr.bf16.mxu1 %v7117_v19  ;;  %5945 = vmatprep.subr.bf16.mxu0 %v7117_v19  ;;  %v7125_v48 = vpack.c.bf16 %v7022_v61, %v7035_v22 }
 0x1b7   :  { %v1468_v24 = vsub.f32 %v1466_v56, %v1467_v40  ;;  %v1480_v10 = vsub.f32 %v1252_v59, %v1320_v8  ;;  %5755 = vmatpush3.bf16.msra.mxu1 %v7117_v19  ;;  %5947 = vmatpush3.bf16.msra.mxu0 %v7117_v19  ;;  %v2041_v39 = vand.u32 4294901760, %v6988_v60  ;;  %v7132_v25 = vpack.c.bf16 %v7046_v55, %v7057_v5 }
 0x1b8   :  { %v1461_v53 = vsub.f32 %v1459_v43, %v1460_v31  ;;  %v7134_v27 = vpack.c.bf16 %v1320_v8, %v1317_v46  ;;  %v1473_v36 = vsub.f32 %v1251_v9, %v1317_v46  ;;  %v5780_v52 = vpack.c.bf16 %v1455_v57, %v1448_v13 }
 0x1b9   :  { %v1469_v29 = vand.u32 4294901760, %v1468_v24  ;;  %v1481_v41 = vand.u32 4294901760, %v1480_v10  ;;  %v7138_v59 = vpack.c.bf16 %v7068_v3, %v7079_v51  ;;  %v7142_v0 = vpack.c.bf16 %v7090_v20, %v7101_v21 }
 0x1ba   :  { %v1462_v60 = vand.u32 4294901760, %v1461_v53  ;;  %v1474_v15 = vand.u32 4294901760, %v1473_v36  ;;  %5757 = vmatprep.subr.bf16.mxu1 %v7134_v27  ;;  %5949 = vmatprep.subr.bf16.mxu0 %v7134_v27  ;;  %v7146_v8 = vpack.c.bf16 %v1466_v56, %v1459_v43  ;;  %v7148_v9 = vpack.c.bf16 %v1480_v10, %v1473_v36 }
 0x1bb   :  { %v1482_v13 = vsub.f32 %v1480_v10, %v1481_v41  ;;  %5759 = vmatpush3.bf16.msra.mxu1 %v7134_v27  ;;  %5951 = vmatpush3.bf16.msra.mxu0 %v7134_v27  ;;  %v7156_v21 = vpack.c.bf16 %v1383_v54, %v1376_v1  ;;  %v7477_v57 = vand.u32 4294901760, %v7001_v17  ;;  %v7478_v24 = vand.u32 4294901760, %v7035_v22 }
 0x1bc   :  { %v1475_v56 = vsub.f32 %v1473_v36, %v1474_v15  ;;  %5761 = vmatprep.subr.bf16.mxu1 %v7050_v63  ;;  %5953 = vmatprep.subr.bf16.mxu0 %v7050_v63  ;;  %v5784_v43 = vpack.c.bf16 %v1469_v29, %v1462_v60  ;;  %v7479_v50 = vand.u32 4294901760, %v7022_v61  ;;  %v7480_v54 = vand.u32 4294901760, %v7057_v5 }
 0x1bd   :  { %v7162_v46 = vpack.c.bf16 %v7477_v57, %v1390_v32  ;;  %v1483_v7 = vand.u32 4294901760, %v1482_v13  ;;  %v7481_v1 = vand.u32 4294901760, %v7046_v55  ;;  %v7482_v49 = vand.u32 4294901760, %v7079_v51 }
 0x1be   :  { %v7170_v10 = vpack.c.bf16 %v7479_v50, %v7478_v24  ;;  %v7483_v32 = vand.u32 4294901760, %v7068_v3  ;;  %v7484_v36 = vand.u32 4294901760, %v7090_v20  ;;  %v1476_v61 = vand.u32 4294901760, %v1475_v56  ;;  %5257 = vmatmul.mubr.f32.vlgmr.msra.gmra.mrb[16].mxu0 %v2041_v39 }
 0x1bf   :  { %v7176_v17 = vpack.c.bf16 %v7481_v1, %v7480_v54  ;;  %v7485_v29 = vand.u32 4294901760, %v6977_v33  ;;  %v7190_v5 = vpack.c.bf16 %v1467_v40, %v1460_v31  ;;  %v7192_v55 = vpack.c.bf16 %v1481_v41, %v1474_v15  ;;  %5955 = vmatpush3.bf16.msra.mxu0 %v7050_v63  ;;  %5291 = vmatprep.mubr.f32.mxu0 %v6937_v34  ;;  %v32_v15 = vld [vmem:[#allocation2 + $0x30] sm:$0xff] }
 0x1c0   :  { %v7182_v53 = vpack.c.bf16 %v7483_v32, %v7482_v49  ;;  %v7186_v22 = vpack.c.bf16 %v7484_v36, %v1446_v23  ;;  %5957 = vmatprep.subr.bf16.mxu0 %v7072_v30  ;;  %v5788_v3 = vpack.c.bf16 %v1483_v7, %v1476_v61  ;;  %v6538_v51 = vmov 1.0  }
 0x1c1   :  { %5047 = vmatmul.mubr.f32.vlgmr.msra.gmra.mrb[0].mxu1 %v7485_v29  ;;  %v7486_v33 = vand.u32 4294901760, %v6941_v37  ;;  %v2654_v41 = vand.u32 4294901760, %v32_v15 }
 0x1c2   :  { %5763 = vmatpush3.bf16.msra.mxu1 %v7050_v63  ;;  %5081 = vmatprep.mubr.msk.f32.mxu1 %vm1262_vm7, %v6538_v51 }
 0x1c3   :  { %5765 = vmatprep.subr.bf16.mxu1 %v7072_v30  ;;  %5959 = vmatpush3.bf16.msra.mxu0 %v7072_v30  ;;  %v2760_v31 = vsub.f32 %v32_v15, %v2654_v41 }
 0x1c4   :  { %5961 = vmatprep.subr.bf16.mxu0 %v7094_v47 }
 0x1c6   :  { %5767 = vmatpush3.bf16.msra.mxu1 %v7072_v30 }
 0x1c7   :  { %5769 = vmatprep.subr.bf16.mxu1 %v7094_v47  ;;  %5963 = vmatpush3.bf16.msra.mxu0 %v7094_v47 }
 0x1c8   :  { %5965 = vmatprep.subr.bf16.mxu0 %v7114_v58 }
 0x1ca   :  { %5771 = vmatpush3.bf16.msra.mxu1 %v7094_v47 }
 0x1cb   :  { %5773 = vmatprep.subr.bf16.mxu1 %v7114_v58  ;;  %5967 = vmatpush3.bf16.msra.mxu0 %v7114_v58 }
 0x1cc   :  { %5969 = vmatprep.subr.bf16.mxu0 %v7119_v14 }
 0x1ce   :  { %5775 = vmatpush3.bf16.msra.mxu1 %v7114_v58 }
 0x1cf   :  { %5777 = vmatprep.subr.bf16.mxu1 %v7119_v14  ;;  %5971 = vmatpush3.bf16.msra.mxu0 %v7119_v14 }
 0x1d0   :  { %5973 = vmatprep.subr.bf16.mxu0 %v5780_v52 }
 0x1d2   :  { %5779 = vmatpush3.bf16.msra.mxu1 %v7119_v14  ;;  %v36_v14 = vld [vmem:[#allocation2 + $0x50] sm:$0xff] }
 0x1d3   :  { %5781 = vmatprep.subr.bf16.mxu1 %v5780_v52  ;;  %5975 = vmatpush3.bf16.msra.mxu0 %v5780_v52  ;;  %v2666_v20 = vand.u32 4294901760, %v36_v14 }
 0x1d4   :  { %5977 = vmatprep.subr.bf16.mxu0 %v5784_v43 }
 0x1d6   :  { %5783 = vmatpush3.bf16.msra.mxu1 %v5780_v52 }
 0x1d7   :  { %5785 = vmatprep.subr.bf16.mxu1 %v5784_v43  ;;  %5979 = vmatpush3.bf16.msra.mxu0 %v5784_v43 }
 0x1d8   :  { %5981 = vmatprep.subr.bf16.mxu0 %v5788_v3 }
 0x1da   :  { %5787 = vmatpush3.bf16.msra.mxu1 %v5784_v43 }
 0x1db   :  { %5789 = vmatprep.subr.bf16.mxu1 %v5788_v3  ;;  %5983 = vmatpush3.bf16.msra.mxu0 %v5788_v3 }
 0x1dc   :  { %5985 = vmatprep.subr.bf16.mxu0 %v6996_v62 }
 0x1de   :  { %5791 = vmatpush3.bf16.msra.mxu1 %v5788_v3  ;;  %5292 = vmatmul.mubr.f32.vlgmr.msra.gmra.mrb[16].mxu0 %v6957_v6 }
 0x1df   :  { %5793 = vmatprep.subr.bf16.mxu1 %v6996_v62  ;;  %5987 = vmatpush3.bf16.msra.mxu0 %v6996_v62 }
 0x1e0   :  { %5989 = vmatprep.subr.bf16.mxu0 %v7028_v4  ;;  %5326 = vmatprep.mubr.f32.mxu0 %v6944_v38 }
 0x1e1   :  { %5082 = vmatmul.mubr.msk.f32.vlgmr.msra.gmra.mrb[0].mxu1 %vm1263_vm8, %v6538_v51 }
 0x1e2   :  { %5795 = vmatpush3.bf16.msra.mxu1 %v6996_v62  ;;  %5116 = vmatprep.mubr.f32.mxu1 %v6941_v37  ;;  %v7487_v62 = vand.u32 4294901760, %v6944_v38  ;;  %v7488_v37 = vand.u32 4294901760, %v6961_v12  ;;  %v7489_v38 = vand.u32 4294901760, %v6965_v2 }
 0x1e3   :  { %5797 = vmatprep.subr.bf16.mxu1 %v7028_v4  ;;  %5991 = vmatpush3.bf16.msra.mxu0 %v7028_v4 }
 0x1e4   :  { %5993 = vmatprep.subr.bf16.mxu0 %v7125_v48 }
 0x1e6   :  { %5799 = vmatpush3.bf16.msra.mxu1 %v7028_v4  ;;  %v33_v4 = vld [vmem:[#allocation2 + $0x38] sm:$0xff] }
 0x1e7   :  { %5801 = vmatprep.subr.bf16.mxu1 %v7125_v48  ;;  %5995 = vmatpush3.bf16.msra.mxu0 %v7125_v48  ;;  %v2657_v63 = vand.u32 4294901760, %v33_v4 }
 0x1e8   :  { %5997 = vmatprep.subr.bf16.mxu0 %v7132_v25 }
 0x1ea   :  { %5803 = vmatpush3.bf16.msra.mxu1 %v7125_v48 }
 0x1eb   :  { %5805 = vmatprep.subr.bf16.mxu1 %v7132_v25  ;;  %5999 = vmatpush3.bf16.msra.mxu0 %v7132_v25 }
 0x1ec   :  { %6001 = vmatprep.subr.bf16.mxu0 %v7138_v59 }
 0x1ee   :  { %5807 = vmatpush3.bf16.msra.mxu1 %v7132_v25 }
 0x1ef   :  { %5809 = vmatprep.subr.bf16.mxu1 %v7138_v59  ;;  %6003 = vmatpush3.bf16.msra.mxu0 %v7138_v59 }
 0x1f0   :  { %6005 = vmatprep.subr.bf16.mxu0 %v7142_v0 }
 0x1f2   :  { %5811 = vmatpush3.bf16.msra.mxu1 %v7138_v59 }
 0x1f3   :  { %5813 = vmatprep.subr.bf16.mxu1 %v7142_v0  ;;  %6007 = vmatpush3.bf16.msra.mxu0 %v7142_v0 }
 0x1f4   :  { %6009 = vmatprep.subr.bf16.mxu0 %v7146_v8 }
 0x1f6   :  { %5815 = vmatpush3.bf16.msra.mxu1 %v7142_v0  ;;  %v34_v0 = vld [vmem:[#allocation2 + $0x40] sm:$0xff] }
 0x1f7   :  { %5817 = vmatprep.subr.bf16.mxu1 %v7146_v8  ;;  %6011 = vmatpush3.bf16.msra.mxu0 %v7146_v8  ;;  %v2660_v30 = vand.u32 4294901760, %v34_v0 }
 0x1f8   :  { %6013 = vmatprep.subr.bf16.mxu0 %v7148_v9 }
 0x1f9   :  { %v7382_v28 = vpack.c.bf16 %v2660_v30, %v2657_v63  ;;  %v2774_v13 = vsub.f32 %v34_v0, %v2660_v30 }
 0x1fa   :  { %5819 = vmatpush3.bf16.msra.mxu1 %v7146_v8 }
 0x1fb   :  { %5821 = vmatprep.subr.bf16.mxu1 %v7148_v9  ;;  %6015 = vmatpush3.bf16.msra.mxu0 %v7148_v9  ;;  %v2775_v43 = vand.u32 4294901760, %v2774_v13 }
 0x1fc   :  { %6017 = vmatprep.subr.bf16.mxu0 %v6979_v44 }
 0x1fd   :  { %v2776_v54 = vsub.f32 %v2774_v13, %v2775_v43 }
 0x1fe   :  { %5823 = vmatpush3.bf16.msra.mxu1 %v7148_v9  ;;  %5327 = vmatmul.mubr.f32.vlgmr.msra.gmra.mrb[16].mxu0 %v6965_v2  ;;  %v2767_v9 = vsub.f32 %v33_v4, %v2657_v63 }
 0x1ff   :  { %5825 = vmatprep.subr.bf16.mxu1 %v6979_v44  ;;  %6019 = vmatpush3.bf16.msra.mxu0 %v6979_v44  ;;  %v2777_v32 = vand.u32 4294901760, %v2776_v54 }
 0x200   :  { %6021 = vmatprep.subr.bf16.mxu0 %v7009_v42  ;;  %5361 = vmatprep.mubr.f32.mxu0 %v7487_v62  ;;  %v2768_v56 = vand.u32 4294901760, %v2767_v9 }
 0x201   :  { %5117 = vmatmul.mubr.f32.vlgmr.msra.gmra.mrb[0].mxu1 %v6961_v12  ;;  %v2645_v12 = vand.u32 4294901760, %v29_v26 }
 0x202   :  { %5827 = vmatpush3.bf16.msra.mxu1 %v6979_v44  ;;  %5151 = vmatprep.mubr.f32.mxu1 %v7486_v33  ;;  %v2769_v7 = vsub.f32 %v2767_v9, %v2768_v56 }
 0x203   :  { %5829 = vmatprep.subr.bf16.mxu1 %v7009_v42  ;;  %6023 = vmatpush3.bf16.msra.mxu0 %v7009_v42  ;;  %v2739_v47 = vsub.f32 %v29_v26, %v2645_v12 }
 0x204   :  { %6025 = vmatprep.subr.bf16.mxu0 %v7033_v18  ;;  %v2770_v49 = vand.u32 4294901760, %v2769_v7 }
 0x205   :  { %v2740_v23 = vand.u32 4294901760, %v2739_v47 }
 0x206   :  { %5831 = vmatpush3.bf16.msra.mxu1 %v7009_v42 }
 0x207   :  { %5833 = vmatprep.subr.bf16.mxu1 %v7033_v18  ;;  %6027 = vmatpush3.bf16.msra.mxu0 %v7033_v18  ;;  %v2741_v48 = vsub.f32 %v2739_v47, %v2740_v23 }
 0x208   :  { %6029 = vmatprep.subr.bf16.mxu0 %v7055_v11 }
 0x209   :  { %v2742_v52 = vand.u32 4294901760, %v2741_v48 }
 0x20a   :  { %5835 = vmatpush3.bf16.msra.mxu1 %v7033_v18 }
 0x20b   :  { %5837 = vmatprep.subr.bf16.mxu1 %v7055_v11  ;;  %6031 = vmatpush3.bf16.msra.mxu0 %v7055_v11 }
 0x20c   :  { %6033 = vmatprep.subr.bf16.mxu0 %v7077_v45 }
 0x20e   :  { %5839 = vmatpush3.bf16.msra.mxu1 %v7055_v11 }
 0x20f   :  { %5841 = vmatprep.subr.bf16.mxu1 %v7077_v45  ;;  %6035 = vmatpush3.bf16.msra.mxu0 %v7077_v45 }
 0x210   :  { %6037 = vmatprep.subr.bf16.mxu0 %v7099_v35 }
 0x212   :  { %5843 = vmatpush3.bf16.msra.mxu1 %v7077_v45 }
 0x213   :  { %5845 = vmatprep.subr.bf16.mxu1 %v7099_v35  ;;  %6039 = vmatpush3.bf16.msra.mxu0 %v7099_v35 }
 0x214   :  { %6041 = vmatprep.subr.bf16.mxu0 %v7117_v19 }
 0x216   :  { %5847 = vmatpush3.bf16.msra.mxu1 %v7099_v35 }
 0x217   :  { %5849 = vmatprep.subr.bf16.mxu1 %v7117_v19  ;;  %6043 = vmatpush3.bf16.msra.mxu0 %v7117_v19 }
 0x218   :  { %6045 = vmatprep.subr.bf16.mxu0 %v7134_v27 }
 0x21a   :  { %5851 = vmatpush3.bf16.msra.mxu1 %v7117_v19 }
 0x21b   :  { %5853 = vmatprep.subr.bf16.mxu1 %v7134_v27  ;;  %6047 = vmatpush3.bf16.msra.mxu0 %v7134_v27 }
 0x21c   :  { %6049 = vmatprep.subr.bf16.mxu0 %v7156_v21 }
 0x21e   :  { %5855 = vmatpush3.bf16.msra.mxu1 %v7134_v27  ;;  %5362 = vmatmul.mubr.f32.vlgmr.msra.gmra.mrb[16].mxu0 %v7489_v38  ;;  %v6184_v38 = vpack.c.bf16 %v2775_v43, %v2768_v56 }
 0x21f   :  { %5857 = vmatprep.subr.bf16.mxu1 %v7156_v21  ;;  %6051 = vmatpush3.bf16.msra.mxu0 %v7156_v21 }
 0x220   :  { %6053 = vmatprep.subr.bf16.mxu0 %v7162_v46  ;;  %5396 = vmatprep.mubr.f32.mxu0 %v6937_v34 }
 0x221   :  { %5152 = vmatmul.mubr.f32.vlgmr.msra.gmra.mrb[0].mxu1 %v7488_v37 }
 0x222   :  { %5859 = vmatpush3.bf16.msra.mxu1 %v7156_v21  ;;  %5186 = vmatprep.mubr.msk.f32.mxu1 %vm1262_vm7, %v6538_v51 }
 0x223   :  { %5861 = vmatprep.subr.bf16.mxu1 %v7162_v46  ;;  %6055 = vmatpush3.bf16.msra.mxu0 %v7162_v46 }
 0x224   :  { %6057 = vmatprep.subr.bf16.mxu0 %v7170_v10 }
 0x226   :  { %5863 = vmatpush3.bf16.msra.mxu1 %v7162_v46 }
 0x227   :  { %5865 = vmatprep.subr.bf16.mxu1 %v7170_v10  ;;  %6059 = vmatpush3.bf16.msra.mxu0 %v7170_v10 }
 0x228   :  { %6061 = vmatprep.subr.bf16.mxu0 %v7176_v17 }
 0x22a   :  { %5867 = vmatpush3.bf16.msra.mxu1 %v7170_v10  ;;  %v2788_v10 = vsub.f32 %v36_v14, %v2666_v20 }
 0x22b   :  { %5869 = vmatprep.subr.bf16.mxu1 %v7176_v17  ;;  %6063 = vmatpush3.bf16.msra.mxu0 %v7176_v17 }
 0x22c   :  { %6065 = vmatprep.subr.bf16.mxu0 %v7182_v53 }
 0x22e   :  { %5871 = vmatpush3.bf16.msra.mxu1 %v7176_v17  ;;  %v2789_v17 = vand.u32 4294901760, %v2788_v10 }
 0x22f   :  { %5873 = vmatprep.subr.bf16.mxu1 %v7182_v53  ;;  %6067 = vmatpush3.bf16.msra.mxu0 %v7182_v53 }
 0x230   :  { %6069 = vmatprep.subr.bf16.mxu0 %v7186_v22  ;;  %v2790_v36 = vsub.f32 %v2788_v10, %v2789_v17 }
 0x232   :  { %5875 = vmatpush3.bf16.msra.mxu1 %v7182_v53  ;;  %v2791_v29 = vand.u32 4294901760, %v2790_v36 }
 0x233   :  { %5877 = vmatprep.subr.bf16.mxu1 %v7186_v22  ;;  %6071 = vmatpush3.bf16.msra.mxu0 %v7186_v22 }
 0x234   :  { %6073 = vmatprep.subr.bf16.mxu0 %v7190_v5 }
 0x236   :  { %5879 = vmatpush3.bf16.msra.mxu1 %v7186_v22  ;;  %v6136_v22 = vpack.c.bf16 %v2777_v32, %v2770_v49 }
 0x237   :  { %5881 = vmatprep.subr.bf16.mxu1 %v7190_v5  ;;  %6075 = vmatpush3.bf16.msra.mxu0 %v7190_v5 }
 0x238   :  { %6077 = vmatprep.subr.bf16.mxu0 %v7192_v55 }
 0x23a   :  { %5883 = vmatpush3.bf16.msra.mxu1 %v7190_v5 }
 0x23b   :  { %5885 = vmatprep.subr.bf16.mxu1 %v7192_v55  ;;  %6079 = vmatpush3.bf16.msra.mxu0 %v7192_v55 }
 0x23c   :  { %6081 = vmatprep.subr.bf16.mxu0 %v6979_v44 }
 0x23e   :  { %5887 = vmatpush3.bf16.msra.mxu1 %v7192_v55  ;;  %5397 = vmatmul.mubr.f32.vlgmr.msra.gmra.mrb[16].mxu0 %v6957_v6 }
 0x23f   :  { %5889 = vmatprep.subr.bf16.mxu1 %v6979_v44  ;;  %6083 = vmatpush3.bf16.msra.mxu0 %v6979_v44 }
 0x240   :  { %6085 = vmatprep.subr.bf16.mxu0 %v7009_v42  ;;  %5431 = vmatprep.mubr.f32.mxu0 %v6937_v34  ;;  %v30_v34 = vld [vmem:[#allocation2 + $0x20] sm:$0xff] }
 0x241   :  { %5187 = vmatmul.mubr.msk.f32.vlgmr.msra.gmra.mrb[0].mxu1 %vm1263_vm8, %v6538_v51  ;;  %v2648_v2 = vand.u32 4294901760, %v30_v34 }
 0x242   :  { %5891 = vmatpush3.bf16.msra.mxu1 %v6979_v44  ;;  %5221 = vmatprep.mubr.msk.f32.mxu1 %vm1262_vm7, %v6538_v51 }
 0x243   :  { %5893 = vmatprep.subr.bf16.mxu1 %v7009_v42  ;;  %6087 = vmatpush3.bf16.msra.mxu0 %v7009_v42  ;;  %v7370_v44 = vpack.c.bf16 %v2648_v2, %v2645_v12 }
 0x244   :  { %6089 = vmatprep.subr.bf16.mxu0 %v7033_v18 }
 0x246   :  { %5895 = vmatpush3.bf16.msra.mxu1 %v7009_v42  ;;  %v31_v42 = vld [vmem:[#allocation2 + $0x28] sm:$0xff] }
 0x247   :  { %5897 = vmatprep.subr.bf16.mxu1 %v7033_v18  ;;  %6091 = vmatpush3.bf16.msra.mxu0 %v7033_v18 }
 0x248   :  { %6093 = vmatprep.subr.bf16.mxu0 %v7055_v11 }
 0x24a   :  { %5899 = vmatpush3.bf16.msra.mxu1 %v7033_v18  ;;  %v2651_v18 = vand.u32 4294901760, %v31_v42 }
 0x24b   :  { %5901 = vmatprep.subr.bf16.mxu1 %v7055_v11  ;;  %6095 = vmatpush3.bf16.msra.mxu0 %v7055_v11 }
 0x24c   :  { %6097 = vmatprep.subr.bf16.mxu0 %v7077_v45 }
 0x24e   :  { %5903 = vmatpush3.bf16.msra.mxu1 %v7055_v11  ;;  %v35_v11 = vld [vmem:[#allocation2 + $0x48] sm:$0xff] }
 0x24f   :  { %5905 = vmatprep.subr.bf16.mxu1 %v7077_v45  ;;  %6099 = vmatpush3.bf16.msra.mxu0 %v7077_v45  ;;  %v2663_v40 = vand.u32 4294901760, %v35_v11 }
 0x250   :  { %6101 = vmatprep.subr.bf16.mxu0 %v7099_v35 }
 0x251   :  { %v2781_v50 = vsub.f32 %v35_v11, %v2663_v40 }
 0x252   :  { %5907 = vmatpush3.bf16.msra.mxu1 %v7077_v45  ;;  %v7380_v45 = vpack.c.bf16 %v2654_v41, %v2651_v18 }
 0x253   :  { %5909 = vmatprep.subr.bf16.mxu1 %v7099_v35  ;;  %6103 = vmatpush3.bf16.msra.mxu0 %v7099_v35  ;;  %v2782_v1 = vand.u32 4294901760, %v2781_v50  ;;  %v6156_v33 = vpack.c.bf16 %v2788_v10, %v2781_v50 }
 0x254   :  { %6105 = vmatprep.subr.bf16.mxu0 %v7117_v19 }
 0x255   :  { %v2783_v53 = vsub.f32 %v2781_v50, %v2782_v1  ;;  %v6188_v26 = vpack.c.bf16 %v2789_v17, %v2782_v1 }
 0x256   :  { %5911 = vmatpush3.bf16.msra.mxu1 %v7099_v35  ;;  %v2746_v35 = vsub.f32 %v30_v34, %v2648_v2 }
 0x257   :  { %5913 = vmatprep.subr.bf16.mxu1 %v7117_v19  ;;  %6107 = vmatpush3.bf16.msra.mxu0 %v7117_v19  ;;  %v2784_v61 = vand.u32 4294901760, %v2783_v53 }
 0x258   :  { %6109 = vmatprep.subr.bf16.mxu0 %v7134_v27  ;;  %v2747_v58 = vand.u32 4294901760, %v2746_v35  ;;  %v6144_v5 = vpack.c.bf16 %v2746_v35, %v2739_v47 }
 0x259   :  { %v6140_v55 = vpack.c.bf16 %v2791_v29, %v2784_v61 }
 0x25a   :  { %5915 = vmatpush3.bf16.msra.mxu1 %v7117_v19  ;;  %v2753_v19 = vsub.f32 %v31_v42, %v2651_v18  ;;  %v2748_v39 = vsub.f32 %v2746_v35, %v2747_v58  ;;  %v6176_v62 = vpack.c.bf16 %v2747_v58, %v2740_v23  ;;  %v37_v23 = vld [vmem:[#allocation2 + $0x58] sm:$0xff]  ;;  %v38_v58 = vld [vmem:[#allocation2 + $0x60] sm:$0xff] }
 0x25b   :  { %5917 = vmatprep.subr.bf16.mxu1 %v7134_v27  ;;  %6111 = vmatpush3.bf16.msra.mxu0 %v7134_v27  ;;  %v3240_v48 = vand.u32 4294901760, %v38_v58 }
 0x25c   :  { %v2754_v25 = vand.u32 4294901760, %v2753_v19  ;;  %v2749_v59 = vand.u32 4294901760, %v2748_v39  ;;  %v6148_v3 = vpack.c.bf16 %v2760_v31, %v2753_v19 }
 0x25e   :  { %5919 = vmatpush3.bf16.msra.mxu1 %v7134_v27  ;;  %5432 = vmatmul.mubr.f32.vlgmr.msra.gmra.mrb[16].mxu0 %v6957_v6  ;;  %v7387_v6 = vpack.c.bf16 %v2666_v20, %v2663_v40  ;;  %v2761_v27 = vand.u32 4294901760, %v2760_v31  ;;  %v2755_v60 = vsub.f32 %v2753_v19, %v2754_v25  ;;  %v6128_v21 = vpack.c.bf16 %v2749_v59, %v2742_v52  ;;  %v39_v19 = vld [vmem:[#allocation2 + $0x68] sm:$0xff] }
 0x25f   :  { %6113 = vmatprep.subr.bf16.mxu1 %v7370_v44  ;;  %v3243_v39 = vand.u32 4294901760, %v39_v19 }
 0x260   :  { %v2762_v8 = vsub.f32 %v2760_v31, %v2761_v27  ;;  %v2756_v57 = vand.u32 4294901760, %v2755_v60  ;;  %v6180_v37 = vpack.c.bf16 %v2761_v27, %v2754_v25  ;;  %v3237_v31 = vand.u32 4294901760, %v37_v23  ;;  %v41_v25 = vld [vmem:[#allocation2 + $0x78] sm:$0xff]  ;;  %v42_v27 = vld [vmem:[#allocation2 + $0x80] sm:$0xff] }
 0x261   :  { %5222 = vmatmul.mubr.msk.f32.vlgmr.msra.gmra.mrb[0].mxu1 %vm1263_vm8, %v6538_v51  ;;  %v6152_v51 = vpack.c.bf16 %v2774_v13, %v2767_v9  ;;  %v3249_v59 = vand.u32 4294901760, %v41_v25  ;;  %v3252_v60 = vand.u32 4294901760, %v42_v27 }
 0x262   :  { %6115 = vmatpush3.bf16.msra.mxu1 %v7370_v44  ;;  %v2763_v46 = vand.u32 4294901760, %v2762_v8  ;;  %v44_v8 = vld [vmem:[#allocation2 + $0x90] sm:$0xff] }
 0x263   :  { %6117 = vmatprep.subr.bf16.mxu1 %v7380_v45  ;;  %v3258_v13 = vand.u32 4294901760, %v44_v8  ;;  %v3366_v61 = vsub.f32 %v42_v27, %v3252_v60 }
 0x264   :  { %v6132_v24 = vpack.c.bf16 %v2763_v46, %v2756_v57  ;;  %v3331_v57 = vsub.f32 %v37_v23, %v3237_v31  ;;  %v3338_v46 = vsub.f32 %v38_v58, %v3240_v48  ;;  %v4357_v23 = vld [vmem:[#allocation2 + $0xa9] ss:$0 sm:$0xff] }
 0x266   :  { %6119 = vmatpush3.bf16.msra.mxu1 %v7380_v45  ;;  %v3332_v56 = vand.u32 4294901760, %v3331_v57  ;;  %v3339_v43 = vand.u32 4294901760, %v3338_v46 }
 0x267   :  { %6121 = vmatprep.subr.bf16.mxu1 %v7382_v28 }
 0x268   :  { %v3333_v7 = vsub.f32 %v3331_v57, %v3332_v56  ;;  %v3340_v54 = vsub.f32 %v3338_v46, %v3339_v43 }
 0x26a   :  { %6123 = vmatpush3.bf16.msra.mxu1 %v7382_v28  ;;  %v3334_v49 = vand.u32 4294901760, %v3333_v7  ;;  %v3341_v32 = vand.u32 4294901760, %v3340_v54 }
 0x26b   :  { %6125 = vmatprep.subr.bf16.mxu1 %v7387_v6 }
 0x26c   :  { %v6224_v29 = vpack.c.bf16 %v3341_v32, %v3334_v49 }
 0x26e   :  { %6127 = vmatpush3.bf16.msra.mxu1 %v7387_v6 }
 0x26f   :  { %6129 = vmatprep.subr.bf16.mxu1 %v6128_v21 }
 0x331   :  { %v5433_v12 = vpop.f32.mrb[16].mxu0 }
 0x332   :  { %v2620_v15 = vpop.f32.mrb[17].mxu0 }
 0x334   :  { %v5223_v34 = vpop.f32.mrb[0].mxu1 }
 0x335   :  { %v2632_v2 = vsel %vm2630_vm9, %v5223_v34, %v5433_v12  ;;  %v1937_v42 = vpop.f32.mrb[1].mxu1 }
 0x336   :  { %v2642_v4 = vsel %vm2637_vm10, %v2632_v2, 0  ;;  %v2631_v18 = vsel %vm2630_vm9, %v1937_v42, %v2620_v15 }
 0x337   :  { %v2727_v41 = vand.u32 4294901760, %v2642_v4  ;;  %v2639_v0 = vsel %vm2637_vm10, %v2631_v18, 0 }
 0x338   :  { %v2717_v63 = vand.u32 4294901760, %v2639_v0 }
 0x339   :  { %v2728_v11 = vsub.f32 %v2642_v4, %v2727_v41 }
 0x33a   :  { %v2718_v14 = vsub.f32 %v2639_v0, %v2717_v63 }
 0x33b   :  { %v2729_v30 = vand.u32 4294901760, %v2728_v11 }
 0x33c   :  { %v2719_v40 = vand.u32 4294901760, %v2718_v14 }
 0x33d   :  { %v2730_v20 = vsub.f32 %v2728_v11, %v2729_v30 }
 0x33e   :  { %v2720_v47 = vsub.f32 %v2718_v14, %v2719_v40 }
 0x33f   :  { %v2731_v35 = vand.u32 4294901760, %v2730_v20  ;;  %v6272_v20 = vpack.c.bf16 %v3339_v43, %v3332_v56  ;;  %v45_v43 = vld [vmem:[#allocation2 + $0x98] sm:$0xff] }
 0x340   :  { %v2721_v16 = vand.u32 4294901760, %v2720_v47 }
 0x342   :  { %5450 = vmatprep.mubr.f32.mxu1 %v2721_v16 }
 0x343   :  { %5451 = vmatmul.mubr.f32.vlgmr.msra.gmra.mrb[2].mxu1 %v2731_v35 }
 0x344   :  { %6131 = vmatpush3.bf16.msra.mxu1 %v6128_v21  ;;  %5469 = vmatprep.mubr.f32.mxu1 %v2717_v63  ;;  %v7418_v21 = vpack.c.bf16 %v3252_v60, %v3249_v59 }
 0x345   :  { %6133 = vmatprep.subr.bf16.mxu1 %v6132_v24 }
 0x348   :  { %6135 = vmatpush3.bf16.msra.mxu1 %v6132_v24  ;;  %v3345_v24 = vsub.f32 %v39_v19, %v3243_v39 }
 0x349   :  { %6137 = vmatprep.subr.bf16.mxu1 %v6136_v22 }
 0x34a   :  { %v3346_v1 = vand.u32 4294901760, %v3345_v24 }
 0x34c   :  { %6139 = vmatpush3.bf16.msra.mxu1 %v6136_v22  ;;  %v3347_v53 = vsub.f32 %v3345_v24, %v3346_v1  ;;  %v3359_v22 = vsub.f32 %v41_v25, %v3249_v59 }
 0x34d   :  { %6141 = vmatprep.subr.bf16.mxu1 %v6140_v55 }
 0x350   :  { %6143 = vmatpush3.bf16.msra.mxu1 %v6140_v55 }
 0x351   :  { %6145 = vmatprep.subr.bf16.mxu1 %v6144_v5 }
 0x353   :  { %5470 = vmatmul.mubr.f32.vlgmr.msra.gmra.mrb[2].mxu1 %v2727_v41 }
 0x354   :  { %6147 = vmatpush3.bf16.msra.mxu1 %v6144_v5  ;;  %5488 = vmatprep.mubr.f32.mxu1 %v2718_v14  ;;  %v3348_v5 = vand.u32 4294901760, %v3347_v53 }
 0x355   :  { %6149 = vmatprep.subr.bf16.mxu1 %v6148_v3 }
 0x358   :  { %6151 = vmatpush3.bf16.msra.mxu1 %v6148_v3  ;;  %v3360_v3 = vand.u32 4294901760, %v3359_v22 }
 0x359   :  { %6153 = vmatprep.subr.bf16.mxu1 %v6152_v51 }
 0x35c   :  { %6155 = vmatpush3.bf16.msra.mxu1 %v6152_v51  ;;  %v3367_v51 = vand.u32 4294901760, %v3366_v61 }
 0x35d   :  { %6157 = vmatprep.subr.bf16.mxu1 %v6156_v33 }
 0x35e   :  { %v6280_v16 = vpack.c.bf16 %v3367_v51, %v3360_v3 }
 0x360   :  { %6159 = vmatpush3.bf16.msra.mxu1 %v6156_v33 }
 0x361   :  { %6161 = vmatprep.subr.bf16.mxu1 %v7370_v44 }
 0x363   :  { %5489 = vmatmul.mubr.f32.vlgmr.msra.gmra.mrb[2].mxu1 %v2728_v11 }
 0x364   :  { %6163 = vmatpush3.bf16.msra.mxu1 %v7370_v44  ;;  %5507 = vmatprep.mubr.f32.mxu1 %v2719_v40 }
 0x365   :  { %6165 = vmatprep.subr.bf16.mxu1 %v7380_v45 }
 0x368   :  { %6167 = vmatpush3.bf16.msra.mxu1 %v7380_v45 }
 0x369   :  { %6169 = vmatprep.subr.bf16.mxu1 %v7382_v28 }
 0x36c   :  { %6171 = vmatpush3.bf16.msra.mxu1 %v7382_v28 }
 0x36d   :  { %6173 = vmatprep.subr.bf16.mxu1 %v7387_v6 }
 0x370   :  { %6175 = vmatpush3.bf16.msra.mxu1 %v7387_v6 }
 0x371   :  { %6177 = vmatprep.subr.bf16.mxu1 %v6176_v62 }
 0x373   :  { %5508 = vmatmul.mubr.f32.vlgmr.msra.gmra.mrb[2].mxu1 %v2729_v30  ;;  %v6248_v30 = vpack.c.bf16 %v3366_v61, %v3359_v22 }
 0x374   :  { %6179 = vmatpush3.bf16.msra.mxu1 %v6176_v62  ;;  %5526 = vmatprep.mubr.f32.mxu1 %v2717_v63 }
 0x375   :  { %6181 = vmatprep.subr.bf16.mxu1 %v6180_v37 }
 0x378   :  { %6183 = vmatpush3.bf16.msra.mxu1 %v6180_v37  ;;  %v3380_v37 = vsub.f32 %v44_v8, %v3258_v13 }
 0x379   :  { %6185 = vmatprep.subr.bf16.mxu1 %v6184_v38 }
 0x37a   :  { %v3381_v12 = vand.u32 4294901760, %v3380_v37 }
 0x37c   :  { %6187 = vmatpush3.bf16.msra.mxu1 %v6184_v38  ;;  %v3361_v38 = vsub.f32 %v3359_v22, %v3360_v3  ;;  %v3382_v4 = vsub.f32 %v3380_v37, %v3381_v12 }
 0x37d   :  { %6189 = vmatprep.subr.bf16.mxu1 %v6188_v26 }
 0x37e   :  { %v3362_v2 = vand.u32 4294901760, %v3361_v38  ;;  %v3383_v0 = vand.u32 4294901760, %v3382_v4 }
 0x380   :  { %6191 = vmatpush3.bf16.msra.mxu1 %v6188_v26  ;;  %v3368_v26 = vsub.f32 %v3366_v61, %v3367_v51  ;;  %v4358_v61 = vld [vmem:[#allocation2 + $0xaa] ss:$0 sm:$0xff] }
 0x381   :  { %6193 = vmatprep.subr.bf16.mxu1 %v7370_v44 }
 0x382   :  { %v3369_v42 = vand.u32 4294901760, %v3368_v26 }
 0x383   :  { %5527 = vmatmul.mubr.f32.vlgmr.msra.gmra.mrb[2].mxu1 %v2727_v41 }
 0x384   :  { %6195 = vmatpush3.bf16.msra.mxu1 %v7370_v44  ;;  %5545 = vmatprep.mubr.f32.mxu1 %v2717_v63  ;;  %v40_v44 = vld [vmem:[#allocation2 + $0x70] sm:$0xff]  ;;  %v6232_v18 = vpack.c.bf16 %v3369_v42, %v3362_v2  ;;  %v6240_v63 = vpack.c.bf16 %v3338_v46, %v3331_v57 }
 0x385   :  { %6197 = vmatprep.subr.bf16.mxu1 %v7380_v45  ;;  %v3246_v52 = vand.u32 4294901760, %v40_v44 }
 0x387   :  { %v7413_v9 = vpack.c.bf16 %v3246_v52, %v3243_v39  ;;  %v3352_v50 = vsub.f32 %v40_v44, %v3246_v52 }
 0x388   :  { %6199 = vmatpush3.bf16.msra.mxu1 %v7380_v45  ;;  %v7411_v45 = vpack.c.bf16 %v3240_v48, %v3237_v31 }
 0x389   :  { %6201 = vmatprep.subr.bf16.mxu1 %v7382_v28  ;;  %v3353_v17 = vand.u32 4294901760, %v3352_v50  ;;  %v6244_v14 = vpack.c.bf16 %v3352_v50, %v3345_v24  ;;  %v46_v24 = vld [vmem:[#allocation2 + $0xa0] sm:$0xff] }
 0x38a   :  { %v3833_v7 = vand.u32 4294901760, %v46_v24 }
 0x38b   :  { %v3354_v36 = vsub.f32 %v3352_v50, %v3353_v17  ;;  %v6276_v47 = vpack.c.bf16 %v3353_v17, %v3346_v1  ;;  %v3830_v50 = vand.u32 4294901760, %v45_v43 }
 0x38c   :  { %6203 = vmatpush3.bf16.msra.mxu1 %v7382_v28  ;;  %v43_v28 = vld [vmem:[#allocation2 + $0x88] sm:$0xff]  ;;  %v3925_v1 = vsub.f32 %v46_v24, %v3833_v7 }
 0x38d   :  { %6205 = vmatprep.subr.bf16.mxu1 %v7387_v6  ;;  %v3355_v55 = vand.u32 4294901760, %v3354_v36  ;;  %v6304_v54 = vpack.c.bf16 %v3833_v7, %v3830_v50 }
 0x38f   :  { %v6228_v33 = vpack.c.bf16 %v3355_v55, %v3348_v5  ;;  %6305 = vmatprep.subr.bf16.mxu0 %v6304_v54 }
 0x390   :  { %6207 = vmatpush3.bf16.msra.mxu1 %v7387_v6  ;;  %v3255_v6 = vand.u32 4294901760, %v43_v28  ;;  %6307 = vmatpush3.bf16.msra.mxu0 %v6304_v54 }
 0x391   :  { %6209 = vmatprep.subr.bf16.mxu1 %v7411_v45 }
 0x392   :  { %v7421_v10 = vpack.c.bf16 %v3258_v13, %v3255_v6  ;;  %v3373_v62 = vsub.f32 %v43_v28, %v3255_v6 }
 0x393   :  { %5546 = vmatmul.mubr.f32.vlgmr.msra.gmra.mrb[2].mxu1 %v2727_v41 }
 0x394   :  { %6211 = vmatpush3.bf16.msra.mxu1 %v7411_v45  ;;  %v3374_v34 = vand.u32 4294901760, %v3373_v62  ;;  %v6252_v40 = vpack.c.bf16 %v3380_v37, %v3373_v62 }
 0x395   :  { %6213 = vmatprep.subr.bf16.mxu1 %v7413_v9 }
 0x396   :  { %v3375_v15 = vsub.f32 %v3373_v62, %v3374_v34  ;;  %v6284_v35 = vpack.c.bf16 %v3381_v12, %v3374_v34 }
 0x398   :  { %6215 = vmatpush3.bf16.msra.mxu1 %v7413_v9  ;;  %v3376_v41 = vand.u32 4294901760, %v3375_v15 }
 0x399   :  { %6217 = vmatprep.subr.bf16.mxu1 %v7418_v21 }
 0x39a   :  { %v6236_v11 = vpack.c.bf16 %v3383_v0, %v3376_v41  ;;  %v4359_v0 = vld [vmem:[#allocation2 + $0xab] ss:$0 sm:$0xff] }
 0x39c   :  { %6219 = vmatpush3.bf16.msra.mxu1 %v7418_v21 }
 0x39d   :  { %6221 = vmatprep.subr.bf16.mxu1 %v7421_v10 }
 0x3a0   :  { %6223 = vmatpush3.bf16.msra.mxu1 %v7421_v10 }
 0x3a1   :  { %6225 = vmatprep.subr.bf16.mxu1 %v6224_v29 }
 0x466   :  { %v5547_v58 = vpop.f32.mrb[2].mxu1 }
 0x467   :  { %v6344_v19 = vadd.f32 %v5547_v58, %v4357_v23  ;;  %v3214_v31 = vpop.f32.mrb[3].mxu1 }
 0x468   :  { %v6345_v48 = vadd.f32 %v4357_v23, %v3214_v31 }
 0x469   :  { %v3225_v44 = vmax.f32 %v6344_v19, 0.0 }
 0x46a   :  { %v3224_v39 = vmax.f32 %v6345_v48, 0.0 }
 0x46b   :  { %v3234_v25 = vsel %vm2637_vm10, %v3225_v44, 0 }
 0x46c   :  { %v3319_v27 = vand.u32 4294901760, %v3234_v25  ;;  %v3231_v52 = vsel %vm2637_vm10, %v3224_v39, 0 }
 0x46d   :  { %v3309_v59 = vand.u32 4294901760, %v3231_v52 }
 0x46e   :  { %v3320_v60 = vsub.f32 %v3234_v25, %v3319_v27 }
 0x46f   :  { %v3310_v28 = vsub.f32 %v3231_v52, %v3309_v59 }
 0x470   :  { %v3321_v8 = vand.u32 4294901760, %v3320_v60 }
 0x471   :  { %v3311_v6 = vand.u32 4294901760, %v3310_v28 }
 0x472   :  { %v3322_v13 = vsub.f32 %v3320_v60, %v3321_v8 }
 0x473   :  { %v3312_v57 = vsub.f32 %v3310_v28, %v3311_v6 }
 0x474   :  { %v3323_v56 = vand.u32 4294901760, %v3322_v13 }
 0x475   :  { %v3313_v46 = vand.u32 4294901760, %v3312_v57 }
 0x477   :  { %5564 = vmatprep.mubr.f32.mxu1 %v3313_v46 }
 0x478   :  { %5565 = vmatmul.mubr.f32.vlgmr.msra.gmra.mrb[4].mxu1 %v3323_v56 }
 0x479   :  { %6227 = vmatpush3.bf16.msra.mxu1 %v6224_v29  ;;  %5583 = vmatprep.mubr.f32.mxu1 %v3309_v59 }
 0x47a   :  { %6229 = vmatprep.subr.bf16.mxu1 %v6228_v33 }
 0x47d   :  { %6231 = vmatpush3.bf16.msra.mxu1 %v6228_v33 }
 0x47e   :  { %6233 = vmatprep.subr.bf16.mxu1 %v6232_v18 }
 0x481   :  { %6235 = vmatpush3.bf16.msra.mxu1 %v6232_v18 }
 0x482   :  { %6237 = vmatprep.subr.bf16.mxu1 %v6236_v11 }
 0x485   :  { %6239 = vmatpush3.bf16.msra.mxu1 %v6236_v11 }
 0x486   :  { %6241 = vmatprep.subr.bf16.mxu1 %v6240_v63 }
 0x488   :  { %5584 = vmatmul.mubr.f32.vlgmr.msra.gmra.mrb[4].mxu1 %v3319_v27 }
 0x489   :  { %6243 = vmatpush3.bf16.msra.mxu1 %v6240_v63  ;;  %5602 = vmatprep.mubr.f32.mxu1 %v3310_v28 }
 0x48a   :  { %6245 = vmatprep.subr.bf16.mxu1 %v6244_v14 }
 0x48d   :  { %6247 = vmatpush3.bf16.msra.mxu1 %v6244_v14 }
 0x48e   :  { %6249 = vmatprep.subr.bf16.mxu1 %v6248_v30 }
 0x491   :  { %6251 = vmatpush3.bf16.msra.mxu1 %v6248_v30 }
 0x492   :  { %6253 = vmatprep.subr.bf16.mxu1 %v6252_v40 }
 0x495   :  { %6255 = vmatpush3.bf16.msra.mxu1 %v6252_v40 }
 0x496   :  { %6257 = vmatprep.subr.bf16.mxu1 %v7411_v45 }
 0x498   :  { %5603 = vmatmul.mubr.f32.vlgmr.msra.gmra.mrb[4].mxu1 %v3320_v60 }
 0x499   :  { %6259 = vmatpush3.bf16.msra.mxu1 %v7411_v45  ;;  %5621 = vmatprep.mubr.f32.mxu1 %v3311_v6 }
 0x49a   :  { %6261 = vmatprep.subr.bf16.mxu1 %v7413_v9 }
 0x49d   :  { %6263 = vmatpush3.bf16.msra.mxu1 %v7413_v9 }
 0x49e   :  { %6265 = vmatprep.subr.bf16.mxu1 %v7418_v21 }
 0x4a1   :  { %6267 = vmatpush3.bf16.msra.mxu1 %v7418_v21 }
 0x4a2   :  { %6269 = vmatprep.subr.bf16.mxu1 %v7421_v10 }
 0x4a5   :  { %6271 = vmatpush3.bf16.msra.mxu1 %v7421_v10 }
 0x4a6   :  { %6273 = vmatprep.subr.bf16.mxu1 %v6272_v20 }
 0x4a8   :  { %5622 = vmatmul.mubr.f32.vlgmr.msra.gmra.mrb[4].mxu1 %v3321_v8 }
 0x4a9   :  { %6275 = vmatpush3.bf16.msra.mxu1 %v6272_v20  ;;  %5640 = vmatprep.mubr.f32.mxu1 %v3309_v59 }
 0x4aa   :  { %6277 = vmatprep.subr.bf16.mxu1 %v6276_v47 }
 0x4ad   :  { %6279 = vmatpush3.bf16.msra.mxu1 %v6276_v47 }
 0x4ae   :  { %6281 = vmatprep.subr.bf16.mxu1 %v6280_v16 }
 0x4b1   :  { %6283 = vmatpush3.bf16.msra.mxu1 %v6280_v16 }
 0x4b2   :  { %6285 = vmatprep.subr.bf16.mxu1 %v6284_v35 }
 0x4b5   :  { %6287 = vmatpush3.bf16.msra.mxu1 %v6284_v35 }
 0x4b6   :  { %6289 = vmatprep.subr.bf16.mxu1 %v7411_v45 }
 0x4b8   :  { %5641 = vmatmul.mubr.f32.vlgmr.msra.gmra.mrb[4].mxu1 %v3319_v27 }
 0x4b9   :  { %6291 = vmatpush3.bf16.msra.mxu1 %v7411_v45  ;;  %5659 = vmatprep.mubr.f32.mxu1 %v3309_v59  ;;  %v3918_v45 = vsub.f32 %v45_v43, %v3830_v50 }
 0x4ba   :  { %6293 = vmatprep.subr.bf16.mxu1 %v7413_v9 }
 0x4bb   :  { %v3919_v17 = vand.u32 4294901760, %v3918_v45  ;;  %v6312_v22 = vpack.c.bf16 %v3925_v1, %v3918_v45 }
 0x4bd   :  { %6295 = vmatpush3.bf16.msra.mxu1 %v7413_v9  ;;  %v3926_v9 = vand.u32 4294901760, %v3925_v1  ;;  %v3920_v49 = vsub.f32 %v3918_v45, %v3919_v17 }
 0x4be   :  { %6297 = vmatprep.subr.bf16.mxu1 %v7418_v21 }
 0x4bf   :  { %v3927_v32 = vsub.f32 %v3925_v1, %v3926_v9  ;;  %v3921_v53 = vand.u32 4294901760, %v3920_v49 }
 0x4c1   :  { %6299 = vmatpush3.bf16.msra.mxu1 %v7418_v21  ;;  %v3928_v21 = vand.u32 4294901760, %v3927_v32 }
 0x4c2   :  { %6301 = vmatprep.subr.bf16.mxu1 %v7421_v10 }
 0x4c3   :  { %v6308_v36 = vpack.c.bf16 %v3928_v21, %v3921_v53 }
 0x4c5   :  { %6303 = vmatpush3.bf16.msra.mxu1 %v7421_v10  ;;  %6309 = vmatprep.subr.bf16.mxu0 %v6308_v36  ;;  %v6320_v10 = vpack.c.bf16 %v3926_v9, %v3919_v17 }
 0x4c8   :  { %5660 = vmatmul.mubr.f32.vlgmr.msra.gmra.mrb[4].mxu1 %v3319_v27 }
 0x59b   :  { %v5661_v29 = vpop.f32.mrb[4].mxu1 }
 0x59c   :  { %v6346_v5 = vadd.f32 %v5661_v29, %v4358_v61  ;;  %v3806_v55 = vpop.f32.mrb[5].mxu1 }
 0x59d   :  { %v6347_v3 = vadd.f32 %v4358_v61, %v3806_v55 }
 0x59e   :  { %v3817_v51 = vmax.f32 %v6346_v5, 0.0 }
 0x59f   :  { %v3816_v33 = vmax.f32 %v6347_v3, 0.0 }
 0x5a0   :  { %v3827_v62 = vsel %vm3822_vm11, %v3817_v51, 0 }
 0x5a1   :  { %v3906_v37 = vand.u32 4294901760, %v3827_v62  ;;  %v3824_v38 = vsel %vm3822_vm11, %v3816_v33, 0 }
 0x5a2   :  { %v3896_v26 = vand.u32 4294901760, %v3824_v38 }
 0x5a3   :  { %v3907_v34 = vsub.f32 %v3827_v62, %v3906_v37 }
 0x5a4   :  { %v3897_v12 = vsub.f32 %v3824_v38, %v3896_v26 }
 0x5a5   :  { %v3908_v2 = vand.u32 4294901760, %v3907_v34 }
 0x5a6   :  { %v3898_v42 = vand.u32 4294901760, %v3897_v12 }
 0x5a7   :  { %v3909_v15 = vsub.f32 %v3907_v34, %v3908_v2 }
 0x5a8   :  { %v3899_v4 = vsub.f32 %v3897_v12, %v3898_v42 }
 0x5a9   :  { %v3910_v41 = vand.u32 4294901760, %v3909_v15 }
 0x5aa   :  { %v3900_v18 = vand.u32 4294901760, %v3899_v4 }
 0x5ac   :  { %5666 = vmatprep.mubr.f32.mxu0 %v3900_v18 }
 0x5ad   :  { %5667 = vmatmul.mubr.f32.vlgmr.msra.gmra.mrb[18].mxu0 %v3910_v41 }
 0x5ae   :  { %6311 = vmatpush3.bf16.msra.mxu0 %v6308_v36  ;;  %5673 = vmatprep.mubr.f32.mxu0 %v3896_v26 }
 0x5af   :  { %6313 = vmatprep.subr.bf16.mxu0 %v6312_v22 }
 0x5b5   :  { %5674 = vmatmul.mubr.f32.vlgmr.msra.gmra.mrb[18].mxu0 %v3906_v37 }
 0x5b6   :  { %6315 = vmatpush3.bf16.msra.mxu0 %v6312_v22  ;;  %5680 = vmatprep.mubr.f32.mxu0 %v3897_v12 }
 0x5b7   :  { %6317 = vmatprep.subr.bf16.mxu0 %v6304_v54 }
 0x5bd   :  { %5681 = vmatmul.mubr.f32.vlgmr.msra.gmra.mrb[18].mxu0 %v3907_v34 }
 0x5be   :  { %6319 = vmatpush3.bf16.msra.mxu0 %v6304_v54  ;;  %5687 = vmatprep.mubr.f32.mxu0 %v3898_v42 }
 0x5bf   :  { %6321 = vmatprep.subr.bf16.mxu0 %v6320_v10 }
 0x5c5   :  { %5688 = vmatmul.mubr.f32.vlgmr.msra.gmra.mrb[18].mxu0 %v3908_v2 }
 0x5c6   :  { %6323 = vmatpush3.bf16.msra.mxu0 %v6320_v10  ;;  %5694 = vmatprep.mubr.f32.mxu0 %v3896_v26 }
 0x5c7   :  { %6325 = vmatprep.subr.bf16.mxu0 %v6304_v54 }
 0x5cd   :  { %5695 = vmatmul.mubr.f32.vlgmr.msra.gmra.mrb[18].mxu0 %v3906_v37 }
 0x5ce   :  { %6327 = vmatpush3.bf16.msra.mxu0 %v6304_v54  ;;  %5701 = vmatprep.mubr.f32.mxu0 %v3896_v26 }
 0x5d5   :  { %5702 = vmatmul.mubr.f32.vlgmr.msra.gmra.mrb[18].mxu0 %v3906_v37 }
 0x6a8   :  { %v5703_v63 = vpop.f32.mrb[18].mxu0 }
 0x6a9   :  { %v6348_v11 = vadd.f32 %v5703_v63, %v4359_v0  ;;  %v4321_v14 = vpop.f32.mrb[19].mxu0 }
 0x6aa   :  { %v6349_v30 = vadd.f32 %v4359_v0, %v4321_v14 }
 0x6ab   :  { %4332 = vst [vmem:[#allocation5 + $0x8] sm:$0xff] %v6348_v11 }
 0x6ac   :  { %4331 = vst [vmem:[#allocation5] sm:$0xff] %v6349_v30 }
 0x6ad   :  { %6519 = shalt.err (!%p6516_p12)
}
 0x6ae   :  { %s6520_s3 = scalar_lea.hbm %s7462_s2, 256 }
 0x6af   :  { %p6521_p13 = scmp.ne.s32.totalorder %s7462_s2, %s6520_s3  ;;  %p6524_p0 = scmp.lt.u32.totalorder %s6520_s3, %s7462_s2 }
 0x6b1   :  { %p6526_p1 = pnand %p6524_p0, %p6521_p13 }
 0x6b3   :  { %6529 = shalt.err (!%p6526_p1)
}
 0x6b4   :  { %4344 = dma.vmem_to_hbm [thread:$0]  %s4339_s28, 256, %s7462_s2, [#allocation4], %s6535_s19, %s6535_s19, %s6536_s20  }
 0x6b5   :  { %6532 = dma.done.wait [#allocation4], 256  }
 0x6b6   :  { %6533 = vsyncadd [#allocation4], 4294967040 }
 0x6b7   :  { %4348 = vsyncpa [#allocation3], 1 }
 0x6b8   :  { %4349 = vsyncpa [#allocation4], 1 }

</bundles_post_ra>
